<compile_context>
chip_gen: v7x
topology: tpu7x:2x2x1
jax: 0.10.0
libtpu: 0.0.40
codegen_flags: <defaults>
</compile_context>

<pallas_src>
import functools
import math

import jax
import jax.numpy as jnp
from jax import lax
from jax.experimental import pallas as pl
from jax.experimental.pallas import tpu as pltpu

EPS = 1e-5
LANE = 128
SUB = 16  # round sublane-sized block dims to 16 (safe for bf16 packing)


def _round_up(x, m):
    return (x + m - 1) // m * m


# ----------------------------------------------------------------------------
# Static per-block geometry (all Python ints; never enters jit as a tracer)
# ----------------------------------------------------------------------------
def _make_geom(*, n, h, w, cin, cout, stride, target_steps=8):
    ho = (h + 2 - 3) // stride + 1
    wo = (w + 2 - 3) // stride + 1
    # Row-band policy: aim for >= target_steps grid steps total, but keep at
    # least 2 output rows per band (each band recomputes a 2-row h1 halo).
    nb = 1
    for cand in range(1, ho + 1):
        if ho % cand == 0 and ho // cand >= 2 and n * cand <= target_steps:
            nb = cand
    r = ho // nb                     # output rows per band
    p = wo + 2                       # row pitch of the extended h1 grid
    m_out = _round_up(r * p, SUB)    # output rows per grid step (padded)
    m_ext = _round_up(max((r + 2) * p, m_out + 2 * p + 2), SUB)
    k1 = 9 * cin                     # packed conv1 reduction (taps outer, c inner)
    return dict(n=n, h=h, w=w, cin=cin, cout=cout, stride=stride,
                ho=ho, wo=wo, nb=nb, r=r, p=p, m_out=m_out, m_ext=m_ext,
                k1=k1, k1p=_round_up(k1, LANE), coutp=_round_up(cout, LANE))


# ----------------------------------------------------------------------------
# Fused BasicBlock kernel (one row band of one image per grid step)
# ----------------------------------------------------------------------------
def _basic_block_kernel(p1_ref, msk_ref, w1_ref, b1_ref, wr_ref, br_ref,
                        w2_ref, b2_ref, o_ref, *, p, m_out):
    """conv1(+BN1 shift)+ReLU -> conv2(+BN2 shift) + residual -> ReLU.
    h1 lives entirely in VMEM/vregs; conv2 is 9 shifted matmuls over the
    flat (row pitch = p) extended h1 grid."""
    patches = p1_ref[...]                                   # (m_ext, k1p) bf16
    # conv1 as one packed-K matmul; BN1 scale folded into w1, shift in b1.
    h1 = jnp.dot(patches, w1_ref[...], preferred_element_type=jnp.float32)
    # mask zeroes: out-of-range h1 rows/cols (== conv2 zero padding) + dummy rows.
    h1 = jnp.maximum(h1 + b1_ref[...], 0.0) * msk_ref[...]
    h1 = h1.astype(jnp.bfloat16)
    # Residual: 1x1 stride-s downsample conv (or identity) == matmul on the
    # centre-tap rows of the SAME patches already resident in VMEM.
    res = jnp.dot(patches[p + 1:p + 1 + m_out, :], wr_ref[...],
                  preferred_element_type=jnp.float32)
    acc = res + br_ref[...] + b2_ref[...]
    # conv2 (3x3, stride 1): 9 shifted matmuls, f32 accumulation.
    for t in range(9):
        off = (t // 3) * p + (t % 3)
        acc = acc + jnp.dot(h1[off:off + m_out, :], w2_ref[t],
                            preferred_element_type=jnp.float32)
    o_ref[...] = jnp.maximum(acc, 0.0).astype(o_ref.dtype)


def _run_block(geom, p1, msk, prep, out_dtype):
    g = geom
    steps = g["n"] * g["nb"]
    kernel = functools.partial(_basic_block_kernel, p=g["p"], m_out=g["m_out"])
    return pl.pallas_call(
        kernel,
        out_shape=jax.ShapeDtypeStruct((steps * g["m_out"], g["coutp"]), out_dtype),
        grid=(steps,),
        in_specs=[
            pl.BlockSpec((g["m_ext"], g["k1p"]), lambda i: (i, 0)),      # patches
            pl.BlockSpec((g["m_ext"], 1), lambda i: (i, 0)),             # validity mask
            pl.BlockSpec((g["k1p"], g["coutp"]), lambda i: (0, 0)),      # w1
            pl.BlockSpec((1, g["coutp"]), lambda i: (0, 0)),             # b1 (BN1 shift)
            pl.BlockSpec((g["k1p"], g["coutp"]), lambda i: (0, 0)),      # wr (residual)
            pl.BlockSpec((1, g["coutp"]), lambda i: (0, 0)),             # br
            pl.BlockSpec((9, g["coutp"], g["coutp"]), lambda i: (0, 0, 0)),  # w2 taps
            pl.BlockSpec((1, g["coutp"]), lambda i: (0, 0)),             # b2 (BN2 shift)
        ],
        out_specs=pl.BlockSpec((g["m_out"], g["coutp"]), lambda i: (i, 0)),
        compiler_params=pltpu.CompilerParams(
            dimension_semantics=("parallel",),
            vmem_limit_bytes=32 * 1024 * 1024),
    )(p1, msk, prep["w1"], prep["b1"], prep["wr"], prep["br"],
      prep["w2"], prep["b2"])


# ----------------------------------------------------------------------------
# Wrapper-side data plumbing (pure XLA data movement; all indices static)
# ----------------------------------------------------------------------------
def _build_patches(x, g):
    """x: (n, h, w, cin), REAL channels only.  Returns one lane-dense bf16
    (m_ext, k1p) patch block per (image, row-band), K packed as 9*cin and
    padded once to k1p."""
    n, h, w, cin = x.shape
    s, ho, wo, r, nb = g["stride"], g["ho"], g["wo"], g["r"], g["nb"]
    top = left = 1 + s
    rows = (ho + 1) * s + 3
    cols = (wo + 1) * s + 3
    xq = jnp.pad(x, ((0, 0), (top, rows - h - top), (left, cols - w - left), (0, 0)))
    taps = []
    for dh in range(3):
        for dw in range(3):
            taps.append(xq[:, dh:dh + s * (ho + 1) + 1:s,
                           dw:dw + s * (wo + 1) + 1:s, :])
    pf = jnp.concatenate(taps, axis=-1)                    # (n, ho+2, wo+2, 9*cin)
    bands = [pf[:, b * r:b * r + r + 2] for b in range(nb)]
    pb = jnp.stack(bands, axis=1)                          # (n, nb, r+2, wo+2, 9*cin)
    pb = pb.reshape(n, nb, (r + 2) * (wo + 2), 9 * cin)
    pb = jnp.pad(pb, ((0, 0), (0, 0),
                      (0, g["m_ext"] - (r + 2) * (wo + 2)),
                      (0, g["k1p"] - 9 * cin)))
    return pb.astype(jnp.bfloat16).reshape(n * nb * g["m_ext"], g["k1p"])


def _build_mask(g):
    """1.0 where the extended h1 position is a real (in-range) h1 pixel."""
    ho, wo, r, nb, n = g["ho"], g["wo"], g["r"], g["nb"], g["n"]
    lg = jnp.arange(ho + 2)[:, None]
    mm = jnp.arange(wo + 2)[None, :]
    mf = ((lg >= 1) & (lg <= ho) & (mm >= 1) & (mm <= wo)).astype(jnp.float32)
    bands = [mf[b * r:b * r + r + 2] for b in range(nb)]
    mb = jnp.stack(bands, 0).reshape(nb, (r + 2) * (wo + 2), 1)
    mb = jnp.pad(mb, ((0, 0), (0, g["m_ext"] - (r + 2) * (wo + 2)), (0, 0)))
    mb = jnp.broadcast_to(mb[None], (n, nb, g["m_ext"], 1))
    return mb.reshape(n * nb * g["m_ext"], 1)


def _assemble(y_flat, g):
    """(steps*m_out, coutp) kernel output -> (n, ho, wo, coutp)."""
    n, nb, r, wo, p = g["n"], g["nb"], g["r"], g["wo"], g["p"]
    y = y_flat.reshape(n, nb, g["m_out"], g["coutp"])[:, :, :r * p, :]
    y = y.reshape(n, nb, r, p, g["coutp"])[:, :, :, :wo, :]
    return y.reshape(n, nb * r, wo, g["coutp"])


def basic_block_apply(prep, x, geom, out_dtype):
    p1 = _build_patches(x, geom)
    msk = _build_mask(geom)
    return _assemble(_run_block(geom, p1, msk, prep, out_dtype), geom)


# ----------------------------------------------------------------------------
# Parameters: raw PyTorch-layout params + prepped (folded / packed / bf16)
# ----------------------------------------------------------------------------
def _fold_bn(gamma, beta, mean, var):
    scale = gamma / jnp.sqrt(var + EPS)
    return scale, beta - mean * scale


def _shift_row(shift, coutp):
    return jnp.pad(shift, (0, coutp - shift.shape[0])).reshape(1, coutp).astype(jnp.float32)


def init_block_params(key, cin, cout, has_downsample):
    """Raw (PyTorch OIHW, f32) BasicBlock parameters with eval-mode BN stats."""
    ks = jax.random.split(key, 6)

    def conv_w(k, ci, co, ksz):
        bound = 1.0 / math.sqrt(ci * ksz * ksz)           # PyTorch Conv2d default
        return jax.random.uniform(k, (co, ci, ksz, ksz), jnp.float32, -bound, bound)

    def bn_stats(k, c):
        k1, k2, k3, k4 = jax.random.split(k, 4)
        gamma = jax.random.uniform(k1, (c,), jnp.float32, 0.5, 1.5)
        beta = 0.1 * jax.random.normal(k2, (c,), jnp.float32)
        mean = 0.1 * jax.random.normal(k3, (c,), jnp.float32)
        var = jax.random.uniform(k4, (c,), jnp.float32, 0.5, 1.5)
        return gamma, beta, mean, var

    raw = {
        "w1": conv_w(ks[0], cin, cout, 3), "bn1": bn_stats(ks[1], cout),
        "w2": conv_w(ks[2], cout, cout, 3), "bn2": bn_stats(ks[3], cout),
    }
    if has_downsample:
        raw["wd"] = conv_w(ks[4], cin, cout, 1)
        raw["bnd"] = bn_stats(ks[5], cout)
    return raw


def prepare_block_params(raw, geom, has_downsample):
    """BN-folded, K-packed, channel-padded, bf16 parameters for the kernel."""
    cin, cout = geom["cin"], geom["cout"]
    k1p, coutp = geom["k1p"], geom["coutp"]
    s1, sh1 = _fold_bn(*raw["bn1"])
    s2, sh2 = _fold_bn(*raw["bn2"])
    # conv1: fold BN1 scale; rows ordered [(dh,dw) outer, cin inner]; pad the
    # PACKED K (9*cin) once to k1p -- no per-tap channel padding.
    w1 = raw["w1"] * s1[:, None, None, None]               # (cout, cin, 3, 3)
    w1 = jnp.transpose(w1, (2, 3, 1, 0)).reshape(9 * cin, cout)
    w1 = jnp.pad(w1, ((0, k1p - 9 * cin), (0, coutp - cout)))
    # conv2: one (coutp, coutp) tap matrix per (dh, dw), BN2 scale folded.
    w2 = raw["w2"] * s2[:, None, None, None]               # (cout, cout, 3, 3)
    w2 = jnp.transpose(w2, (2, 3, 1, 0)).reshape(9, cout, cout)
    w2 = jnp.pad(w2, ((0, 0), (0, coutp - cout), (0, coutp - cout)))
    # Residual branch as a matmul on the centre tap of the conv1 patches.
    centre = 4 * cin
    if has_downsample:
        sd, shd = _fold_bn(*raw["bnd"])
        core = (raw["wd"][:, :, 0, 0] * sd[:, None]).T     # (cin, cout)
        br = shd
    else:
        assert geom["stride"] == 1 and cin == cout, \
            "identity residual requires stride == 1 and cin == cout"
        core = jnp.eye(cin, dtype=jnp.float32)
        br = jnp.zeros((cout,), jnp.float32)
    wr = jnp.zeros((k1p, coutp), jnp.float32).at[centre:centre + cin, :cout].set(core)
    return {"w1": w1.astype(jnp.bfloat16), "b1": _shift_row(sh1, coutp),
            "w2": w2.astype(jnp.bfloat16), "b2": _shift_row(sh2, coutp),
            "wr": wr.astype(jnp.bfloat16), "br": _shift_row(br, coutp)}


# ----------------------------------------------------------------------------
# Demo model: two chained BasicBlocks (downsample block, then identity block)
# ----------------------------------------------------------------------------
N, H, W = 2, 16, 16
CIN, CMID = 4, 8
STRIDE = 2

GEOM_A = _make_geom(n=N, h=H, w=W, cin=CIN, cout=CMID, stride=STRIDE)
GEOM_B = _make_geom(n=N, h=GEOM_A["ho"], w=GEOM_A["wo"], cin=CMID, cout=CMID, stride=1)


def model_forward(prep_a, prep_b, x_nchw):
    """NCHW in / NCHW out, like the PyTorch module."""
    x = jnp.transpose(x_nchw, (0, 2, 3, 1)).astype(jnp.float32)   # NHWC, real channels
    ya = basic_block_apply(prep_a, x, GEOM_A, jnp.bfloat16)        # feeds next block: bf16
    yb = basic_block_apply(prep_b, ya[..., :CMID], GEOM_B, jnp.float32)
    return jnp.transpose(yb[..., :CMID], (0, 3, 1, 2))


# ----------------------------------------------------------------------------
# Plain-JAX reference (loose numerical check; kernel uses bf16 matmul inputs)
# ----------------------------------------------------------------------------
def _ref_bn(x, stats):
    gamma, beta, mean, var = stats
    scale = gamma / jnp.sqrt(var + EPS)
    shift = beta - mean * scale
    return x * scale[None, :, None, None] + shift[None, :, None, None]


def _ref_conv(x, w, stride, pad):
    return lax.conv_general_dilated(
        x, w, window_strides=(stride, stride),
        padding=[(pad, pad), (pad, pad)],
        dimension_numbers=("NCHW", "OIHW", "NCHW"))


def reference_basic_block(x, raw, stride, has_downsample):
    residual = x
    if has_downsample:
        residual = _ref_bn(_ref_conv(x, raw["wd"], stride, 0), raw["bnd"])
    out = jax.nn.relu(_ref_bn(_ref_conv(x, raw["w1"], stride, 1), raw["bn1"]))
    out = _ref_bn(_ref_conv(out, raw["w2"], 1, 1), raw["bn2"])
    return jax.nn.relu(out + residual)


# ----------------------------------------------------------------------------
if __name__ == "__main__":
    kx, ka, kb = jax.random.split(jax.random.PRNGKey(0), 3)
    x = jax.random.normal(kx, (N, CIN, H, W), jnp.float32)

    raw_a = init_block_params(ka, CIN, CMID, has_downsample=True)
    raw_b = init_block_params(kb, CMID, CMID, has_downsample=False)
    prep_a = prepare_block_params(raw_a, GEOM_A, True)
    prep_b = prepare_block_params(raw_b, GEOM_B, False)

    out = jax.jit(model_forward)(prep_a, prep_b, x)
    out = jax.block_until_ready(out)
    assert out.shape == (N, CMID, H // STRIDE, W // STRIDE)
    assert out.dtype == jnp.float32

    ref = reference_basic_block(x, raw_a, STRIDE, True)
    ref = reference_basic_block(ref, raw_b, 1, False)
    err = float(jnp.max(jnp.abs(out - ref)))
    scale = float(jnp.max(jnp.abs(ref))) + 1.0
    assert err <= 3e-2 * scale, f"mismatch: max|err|={err:.4f}, scale={scale:.4f}"

    print("KERNEL_OK")
</pallas_src>

<mosaic_0001>
module attributes {stable_mosaic.version = 11 : i64} {
  func.func @_basic_block_kernel(%arg0: i32, %arg1: memref<64x128xbf16, #tpu.memory_space<vmem>>, %arg2: memref<64x1xf32, #tpu.memory_space<vmem>>, %arg3: memref<128x128xbf16, #tpu.memory_space<vmem>>, %arg4: memref<1x128xf32, #tpu.memory_space<vmem>>, %arg5: memref<128x128xbf16, #tpu.memory_space<vmem>>, %arg6: memref<1x128xf32, #tpu.memory_space<vmem>>, %arg7: memref<9x128x128xbf16, #tpu.memory_space<vmem>>, %arg8: memref<1x128xf32, #tpu.memory_space<vmem>>, %arg9: memref<32x128xbf16, #tpu.memory_space<vmem>>) attributes {dimension_semantics = [#tpu.dimension_semantics<parallel>], iteration_bounds = array<i64: 8>, scalar_prefetch = 0 : i64, scratch_operands = 0 : i64, tpu.core_type = #tpu.core_type<tc>, window_params = [{transform_indices = @transform_0, window_bounds = array<i64: 64, 128>}, {transform_indices = @transform_1, window_bounds = array<i64: 64, 1>}, {pipeline_mode = #tpu.pipeline_mode<synchronous>, transform_indices = @transform_2, window_bounds = array<i64: 128, 128>}, {pipeline_mode = #tpu.pipeline_mode<synchronous>, transform_indices = @transform_3, window_bounds = array<i64: 1, 128>}, {pipeline_mode = #tpu.pipeline_mode<synchronous>, transform_indices = @transform_4, window_bounds = array<i64: 128, 128>}, {pipeline_mode = #tpu.pipeline_mode<synchronous>, transform_indices = @transform_5, window_bounds = array<i64: 1, 128>}, {pipeline_mode = #tpu.pipeline_mode<synchronous>, transform_indices = @transform_6, window_bounds = array<i64: 9, 128, 128>}, {pipeline_mode = #tpu.pipeline_mode<synchronous>, transform_indices = @transform_7, window_bounds = array<i64: 1, 128>}, {transform_indices = @transform_8, window_bounds = array<i64: 32, 128>}]} {
    %c0 = arith.constant 0 : index
    %c0_0 = arith.constant 0 : index
    %0 = vector.load %arg1[%c0, %c0_0] : memref<64x128xbf16, #tpu.memory_space<vmem>>, vector<64x128xbf16>
    %c0_1 = arith.constant 0 : index
    %c0_2 = arith.constant 0 : index
    %1 = vector.load %arg3[%c0_1, %c0_2] : memref<128x128xbf16, #tpu.memory_space<vmem>>, vector<128x128xbf16>
    %cst = arith.constant dense<0.000000e+00> : vector<64x128xf32>
    %2 = tpu.matmul %0, %1, %cst {dimension_numbers = #tpu.dot_dimension_numbers<[1], [0], [0], [1], [0, 0, 1, 1], [], []>} : vector<64x128xbf16>, vector<128x128xbf16>, vector<64x128xf32> -> vector<64x128xf32>
    %c0_3 = arith.constant 0 : index
    %c0_4 = arith.constant 0 : index
    %3 = vector.load %arg4[%c0_3, %c0_4] : memref<1x128xf32, #tpu.memory_space<vmem>>, vector<1x128xf32>
    %4 = vector.broadcast %3 : vector<1x128xf32> to vector<64x128xf32>
    %5 = arith.addf %2, %4 : vector<64x128xf32>
    %cst_5 = arith.constant 0.000000e+00 : f32
    %6 = vector.broadcast %cst_5 : f32 to vector<64x128xf32>
    %7 = arith.maximumf %5, %6 : vector<64x128xf32>
    %c0_6 = arith.constant 0 : index
    %c0_7 = arith.constant 0 : index
    %8 = vector.load %arg2[%c0_6, %c0_7] : memref<64x1xf32, #tpu.memory_space<vmem>>, vector<64x1xf32>
    %9 = vector.broadcast %8 : vector<64x1xf32> to vector<64x128xf32>
    %10 = arith.mulf %7, %9 : vector<64x128xf32>
    %11 = arith.truncf %10 : vector<64x128xf32> to vector<64x128xbf16>
    %12 = vector.extract_strided_slice %0 {offsets = [11, 0], sizes = [32, 128], strides = [1, 1]} : vector<64x128xbf16> to vector<32x128xbf16>
    %c0_8 = arith.constant 0 : index
    %c0_9 = arith.constant 0 : index
    %13 = vector.load %arg5[%c0_8, %c0_9] : memref<128x128xbf16, #tpu.memory_space<vmem>>, vector<128x128xbf16>
    %cst_10 = arith.constant dense<0.000000e+00> : vector<32x128xf32>
    %14 = tpu.matmul %12, %13, %cst_10 {dimension_numbers = #tpu.dot_dimension_numbers<[1], [0], [0], [1], [0, 0, 1, 1], [], []>} : vector<32x128xbf16>, vector<128x128xbf16>, vector<32x128xf32> -> vector<32x128xf32>
    %c0_11 = arith.constant 0 : index
    %c0_12 = arith.constant 0 : index
    %15 = vector.load %arg6[%c0_11, %c0_12] : memref<1x128xf32, #tpu.memory_space<vmem>>, vector<1x128xf32>
    %16 = vector.broadcast %15 : vector<1x128xf32> to vector<32x128xf32>
    %17 = arith.addf %14, %16 : vector<32x128xf32>
    %c0_13 = arith.constant 0 : index
    %c0_14 = arith.constant 0 : index
    %18 = vector.load %arg8[%c0_13, %c0_14] : memref<1x128xf32, #tpu.memory_space<vmem>>, vector<1x128xf32>
    %19 = vector.broadcast %18 : vector<1x128xf32> to vector<32x128xf32>
    %20 = arith.addf %17, %19 : vector<32x128xf32>
    %21 = vector.extract_strided_slice %11 {offsets = [0, 0], sizes = [32, 128], strides = [1, 1]} : vector<64x128xbf16> to vector<32x128xbf16>
    %c0_15 = arith.constant 0 : index
    %c0_16 = arith.constant 0 : index
    %c0_17 = arith.constant 0 : index
    %22 = vector.load %arg7[%c0_15, %c0_16, %c0_17] : memref<9x128x128xbf16, #tpu.memory_space<vmem>>, vector<1x128x128xbf16>
    %23 = vector.shape_cast %22 : vector<1x128x128xbf16> to vector<128x128xbf16>
    %cst_18 = arith.constant dense<0.000000e+00> : vector<32x128xf32>
    %24 = tpu.matmul %21, %23, %cst_18 {dimension_numbers = #tpu.dot_dimension_numbers<[1], [0], [0], [1], [0, 0, 1, 1], [], []>} : vector<32x128xbf16>, vector<128x128xbf16>, vector<32x128xf32> -> vector<32x128xf32>
    %25 = arith.addf %20, %24 : vector<32x128xf32>
    %26 = vector.extract_strided_slice %11 {offsets = [1, 0], sizes = [32, 128], strides = [1, 1]} : vector<64x128xbf16> to vector<32x128xbf16>
    %c1 = arith.constant 1 : index
    %c0_19 = arith.constant 0 : index
    %c0_20 = arith.constant 0 : index
    %27 = vector.load %arg7[%c1, %c0_19, %c0_20] : memref<9x128x128xbf16, #tpu.memory_space<vmem>>, vector<1x128x128xbf16>
    %28 = vector.shape_cast %27 : vector<1x128x128xbf16> to vector<128x128xbf16>
    %cst_21 = arith.constant dense<0.000000e+00> : vector<32x128xf32>
    %29 = tpu.matmul %26, %28, %cst_21 {dimension_numbers = #tpu.dot_dimension_numbers<[1], [0], [0], [1], [0, 0, 1, 1], [], []>} : vector<32x128xbf16>, vector<128x128xbf16>, vector<32x128xf32> -> vector<32x128xf32>
    %30 = arith.addf %25, %29 : vector<32x128xf32>
    %31 = vector.extract_strided_slice %11 {offsets = [2, 0], sizes = [32, 128], strides = [1, 1]} : vector<64x128xbf16> to vector<32x128xbf16>
    %c2 = arith.constant 2 : index
    %c0_22 = arith.constant 0 : index
    %c0_23 = arith.constant 0 : index
    %32 = vector.load %arg7[%c2, %c0_22, %c0_23] : memref<9x128x128xbf16, #tpu.memory_space<vmem>>, vector<1x128x128xbf16>
    %33 = vector.shape_cast %32 : vector<1x128x128xbf16> to vector<128x128xbf16>
    %cst_24 = arith.constant dense<0.000000e+00> : vector<32x128xf32>
    %34 = tpu.matmul %31, %33, %cst_24 {dimension_numbers = #tpu.dot_dimension_numbers<[1], [0], [0], [1], [0, 0, 1, 1], [], []>} : vector<32x128xbf16>, vector<128x128xbf16>, vector<32x128xf32> -> vector<32x128xf32>
    %35 = arith.addf %30, %34 : vector<32x128xf32>
    %36 = vector.extract_strided_slice %11 {offsets = [10, 0], sizes = [32, 128], strides = [1, 1]} : vector<64x128xbf16> to vector<32x128xbf16>
    %c3 = arith.constant 3 : index
    %c0_25 = arith.constant 0 : index
    %c0_26 = arith.constant 0 : index
    %37 = vector.load %arg7[%c3, %c0_25, %c0_26] : memref<9x128x128xbf16, #tpu.memory_space<vmem>>, vector<1x128x128xbf16>
    %38 = vector.shape_cast %37 : vector<1x128x128xbf16> to vector<128x128xbf16>
    %cst_27 = arith.constant dense<0.000000e+00> : vector<32x128xf32>
    %39 = tpu.matmul %36, %38, %cst_27 {dimension_numbers = #tpu.dot_dimension_numbers<[1], [0], [0], [1], [0, 0, 1, 1], [], []>} : vector<32x128xbf16>, vector<128x128xbf16>, vector<32x128xf32> -> vector<32x128xf32>
    %40 = arith.addf %35, %39 : vector<32x128xf32>
    %41 = vector.extract_strided_slice %11 {offsets = [11, 0], sizes = [32, 128], strides = [1, 1]} : vector<64x128xbf16> to vector<32x128xbf16>
    %c4 = arith.constant 4 : index
    %c0_28 = arith.constant 0 : index
    %c0_29 = arith.constant 0 : index
    %42 = vector.load %arg7[%c4, %c0_28, %c0_29] : memref<9x128x128xbf16, #tpu.memory_space<vmem>>, vector<1x128x128xbf16>
    %43 = vector.shape_cast %42 : vector<1x128x128xbf16> to vector<128x128xbf16>
    %cst_30 = arith.constant dense<0.000000e+00> : vector<32x128xf32>
    %44 = tpu.matmul %41, %43, %cst_30 {dimension_numbers = #tpu.dot_dimension_numbers<[1], [0], [0], [1], [0, 0, 1, 1], [], []>} : vector<32x128xbf16>, vector<128x128xbf16>, vector<32x128xf32> -> vector<32x128xf32>
    %45 = arith.addf %40, %44 : vector<32x128xf32>
    %46 = vector.extract_strided_slice %11 {offsets = [12, 0], sizes = [32, 128], strides = [1, 1]} : vector<64x128xbf16> to vector<32x128xbf16>
    %c5 = arith.constant 5 : index
    %c0_31 = arith.constant 0 : index
    %c0_32 = arith.constant 0 : index
    %47 = vector.load %arg7[%c5, %c0_31, %c0_32] : memref<9x128x128xbf16, #tpu.memory_space<vmem>>, vector<1x128x128xbf16>
    %48 = vector.shape_cast %47 : vector<1x128x128xbf16> to vector<128x128xbf16>
    %cst_33 = arith.constant dense<0.000000e+00> : vector<32x128xf32>
    %49 = tpu.matmul %46, %48, %cst_33 {dimension_numbers = #tpu.dot_dimension_numbers<[1], [0], [0], [1], [0, 0, 1, 1], [], []>} : vector<32x128xbf16>, vector<128x128xbf16>, vector<32x128xf32> -> vector<32x128xf32>
    %50 = arith.addf %45, %49 : vector<32x128xf32>
    %51 = vector.extract_strided_slice %11 {offsets = [20, 0], sizes = [32, 128], strides = [1, 1]} : vector<64x128xbf16> to vector<32x128xbf16>
    %c6 = arith.constant 6 : index
    %c0_34 = arith.constant 0 : index
    %c0_35 = arith.constant 0 : index
    %52 = vector.load %arg7[%c6, %c0_34, %c0_35] : memref<9x128x128xbf16, #tpu.memory_space<vmem>>, vector<1x128x128xbf16>
    %53 = vector.shape_cast %52 : vector<1x128x128xbf16> to vector<128x128xbf16>
    %cst_36 = arith.constant dense<0.000000e+00> : vector<32x128xf32>
    %54 = tpu.matmul %51, %53, %cst_36 {dimension_numbers = #tpu.dot_dimension_numbers<[1], [0], [0], [1], [0, 0, 1, 1], [], []>} : vector<32x128xbf16>, vector<128x128xbf16>, vector<32x128xf32> -> vector<32x128xf32>
    %55 = arith.addf %50, %54 : vector<32x128xf32>
    %56 = vector.extract_strided_slice %11 {offsets = [21, 0], sizes = [32, 128], strides = [1, 1]} : vector<64x128xbf16> to vector<32x128xbf16>
    %c7 = arith.constant 7 : index
    %c0_37 = arith.constant 0 : index
    %c0_38 = arith.constant 0 : index
    %57 = vector.load %arg7[%c7, %c0_37, %c0_38] : memref<9x128x128xbf16, #tpu.memory_space<vmem>>, vector<1x128x128xbf16>
    %58 = vector.shape_cast %57 : vector<1x128x128xbf16> to vector<128x128xbf16>
    %cst_39 = arith.constant dense<0.000000e+00> : vector<32x128xf32>
    %59 = tpu.matmul %56, %58, %cst_39 {dimension_numbers = #tpu.dot_dimension_numbers<[1], [0], [0], [1], [0, 0, 1, 1], [], []>} : vector<32x128xbf16>, vector<128x128xbf16>, vector<32x128xf32> -> vector<32x128xf32>
    %60 = arith.addf %55, %59 : vector<32x128xf32>
    %61 = vector.extract_strided_slice %11 {offsets = [22, 0], sizes = [32, 128], strides = [1, 1]} : vector<64x128xbf16> to vector<32x128xbf16>
    %c8 = arith.constant 8 : index
    %c0_40 = arith.constant 0 : index
    %c0_41 = arith.constant 0 : index
    %62 = vector.load %arg7[%c8, %c0_40, %c0_41] : memref<9x128x128xbf16, #tpu.memory_space<vmem>>, vector<1x128x128xbf16>
    %63 = vector.shape_cast %62 : vector<1x128x128xbf16> to vector<128x128xbf16>
    %cst_42 = arith.constant dense<0.000000e+00> : vector<32x128xf32>
    %64 = tpu.matmul %61, %63, %cst_42 {dimension_numbers = #tpu.dot_dimension_numbers<[1], [0], [0], [1], [0, 0, 1, 1], [], []>} : vector<32x128xbf16>, vector<128x128xbf16>, vector<32x128xf32> -> vector<32x128xf32>
    %65 = arith.addf %60, %64 : vector<32x128xf32>
    %cst_43 = arith.constant 0.000000e+00 : f32
    %66 = vector.broadcast %cst_43 : f32 to vector<32x128xf32>
    %67 = arith.maximumf %65, %66 : vector<32x128xf32>
    %68 = arith.truncf %67 : vector<32x128xf32> to vector<32x128xbf16>
    %c0_44 = arith.constant 0 : index
    %c0_45 = arith.constant 0 : index
    %69 = vector.load %arg9[%c0_44, %c0_45] : memref<32x128xbf16, #tpu.memory_space<vmem>>, vector<32x128xbf16>
    tpu.vector_store %arg9[%c0_44, %c0_45], %68 {strides = array<i32>} : memref<32x128xbf16, #tpu.memory_space<vmem>>, vector<32x128xbf16>,
    return
  }
  func.func @transform_0(%arg0: i32) -> (i32, i32) {
    %c0_i32 = arith.constant 0 : i32
    %c0_i32_0 = arith.constant 0 : i32
    return %arg0, %c0_i32 : i32, i32
  }
  func.func @transform_1(%arg0: i32) -> (i32, i32) {
    %c0_i32 = arith.constant 0 : i32
    %c0_i32_0 = arith.constant 0 : i32
    return %arg0, %c0_i32 : i32, i32
  }
  func.func @transform_2(%arg0: i32) -> (i32, i32) {
    %c0_i32 = arith.constant 0 : i32
    %c0_i32_0 = arith.constant 0 : i32
    %c0_i32_1 = arith.constant 0 : i32
    return %c0_i32, %c0_i32_0 : i32, i32
  }
  func.func @transform_3(%arg0: i32) -> (i32, i32) {
    %c0_i32 = arith.constant 0 : i32
    %c0_i32_0 = arith.constant 0 : i32
    %c0_i32_1 = arith.constant 0 : i32
    return %c0_i32, %c0_i32_0 : i32, i32
  }
  func.func @transform_4(%arg0: i32) -> (i32, i32) {
    %c0_i32 = arith.constant 0 : i32
    %c0_i32_0 = arith.constant 0 : i32
    %c0_i32_1 = arith.constant 0 : i32
    return %c0_i32, %c0_i32_0 : i32, i32
  }
  func.func @transform_5(%arg0: i32) -> (i32, i32) {
    %c0_i32 = arith.constant 0 : i32
    %c0_i32_0 = arith.constant 0 : i32
    %c0_i32_1 = arith.constant 0 : i32
    return %c0_i32, %c0_i32_0 : i32, i32
  }
  func.func @transform_6(%arg0: i32) -> (i32, i32, i32) {
    %c0_i32 = arith.constant 0 : i32
    %c0_i32_0 = arith.constant 0 : i32
    %c0_i32_1 = arith.constant 0 : i32
    %c0_i32_2 = arith.constant 0 : i32
    return %c0_i32, %c0_i32_0, %c0_i32_1 : i32, i32, i32
  }
  func.func @transform_7(%arg0: i32) -> (i32, i32) {
    %c0_i32 = arith.constant 0 : i32
    %c0_i32_0 = arith.constant 0 : i32
    %c0_i32_1 = arith.constant 0 : i32
    return %c0_i32, %c0_i32_0 : i32, i32
  }
  func.func @transform_8(%arg0: i32) -> (i32, i32) {
    %c0_i32 = arith.constant 0 : i32
    %c0_i32_0 = arith.constant 0 : i32
    return %arg0, %c0_i32 : i32, i32
  }
}

module attributes {stable_mosaic.version = 11 : i64} {
  func.func @_basic_block_kernel(%arg0: i32, %arg1: memref<64x128xbf16, #tpu.memory_space<vmem>>, %arg2: memref<64x1xf32, #tpu.memory_space<vmem>>, %arg3: memref<128x128xbf16, #tpu.memory_space<vmem>>, %arg4: memref<1x128xf32, #tpu.memory_space<vmem>>, %arg5: memref<128x128xbf16, #tpu.memory_space<vmem>>, %arg6: memref<1x128xf32, #tpu.memory_space<vmem>>, %arg7: memref<9x128x128xbf16, #tpu.memory_space<vmem>>, %arg8: memref<1x128xf32, #tpu.memory_space<vmem>>, %arg9: memref<32x128xf32, #tpu.memory_space<vmem>>) attributes {dimension_semantics = [#tpu.dimension_semantics<parallel>], iteration_bounds = array<i64: 8>, scalar_prefetch = 0 : i64, scratch_operands = 0 : i64, tpu.core_type = #tpu.core_type<tc>, window_params = [{transform_indices = @transform_0, window_bounds = array<i64: 64, 128>}, {transform_indices = @transform_1, window_bounds = array<i64: 64, 1>}, {pipeline_mode = #tpu.pipeline_mode<synchronous>, transform_indices = @transform_2, window_bounds = array<i64: 128, 128>}, {pipeline_mode = #tpu.pipeline_mode<synchronous>, transform_indices = @transform_3, window_bounds = array<i64: 1, 128>}, {pipeline_mode = #tpu.pipeline_mode<synchronous>, transform_indices = @transform_4, window_bounds = array<i64: 128, 128>}, {pipeline_mode = #tpu.pipeline_mode<synchronous>, transform_indices = @transform_5, window_bounds = array<i64: 1, 128>}, {pipeline_mode = #tpu.pipeline_mode<synchronous>, transform_indices = @transform_6, window_bounds = array<i64: 9, 128, 128>}, {pipeline_mode = #tpu.pipeline_mode<synchronous>, transform_indices = @transform_7, window_bounds = array<i64: 1, 128>}, {transform_indices = @transform_8, window_bounds = array<i64: 32, 128>}]} {
    %c0 = arith.constant 0 : index
    %c0_0 = arith.constant 0 : index
    %0 = vector.load %arg1[%c0, %c0_0] : memref<64x128xbf16, #tpu.memory_space<vmem>>, vector<64x128xbf16>
    %c0_1 = arith.constant 0 : index
    %c0_2 = arith.constant 0 : index
    %1 = vector.load %arg3[%c0_1, %c0_2] : memref<128x128xbf16, #tpu.memory_space<vmem>>, vector<128x128xbf16>
    %cst = arith.constant dense<0.000000e+00> : vector<64x128xf32>
    %2 = tpu.matmul %0, %1, %cst {dimension_numbers = #tpu.dot_dimension_numbers<[1], [0], [0], [1], [0, 0, 1, 1], [], []>} : vector<64x128xbf16>, vector<128x128xbf16>, vector<64x128xf32> -> vector<64x128xf32>
    %c0_3 = arith.constant 0 : index
    %c0_4 = arith.constant 0 : index
    %3 = vector.load %arg4[%c0_3, %c0_4] : memref<1x128xf32, #tpu.memory_space<vmem>>, vector<1x128xf32>
    %4 = vector.broadcast %3 : vector<1x128xf32> to vector<64x128xf32>
    %5 = arith.addf %2, %4 : vector<64x128xf32>
    %cst_5 = arith.constant 0.000000e+00 : f32
    %6 = vector.broadcast %cst_5 : f32 to vector<64x128xf32>
    %7 = arith.maximumf %5, %6 : vector<64x128xf32>
    %c0_6 = arith.constant 0 : index
    %c0_7 = arith.constant 0 : index
    %8 = vector.load %arg2[%c0_6, %c0_7] : memref<64x1xf32, #tpu.memory_space<vmem>>, vector<64x1xf32>
    %9 = vector.broadcast %8 : vector<64x1xf32> to vector<64x128xf32>
    %10 = arith.mulf %7, %9 : vector<64x128xf32>
    %11 = arith.truncf %10 : vector<64x128xf32> to vector<64x128xbf16>
    %12 = vector.extract_strided_slice %0 {offsets = [11, 0], sizes = [32, 128], strides = [1, 1]} : vector<64x128xbf16> to vector<32x128xbf16>
    %c0_8 = arith.constant 0 : index
    %c0_9 = arith.constant 0 : index
    %13 = vector.load %arg5[%c0_8, %c0_9] : memref<128x128xbf16, #tpu.memory_space<vmem>>, vector<128x128xbf16>
    %cst_10 = arith.constant dense<0.000000e+00> : vector<32x128xf32>
    %14 = tpu.matmul %12, %13, %cst_10 {dimension_numbers = #tpu.dot_dimension_numbers<[1], [0], [0], [1], [0, 0, 1, 1], [], []>} : vector<32x128xbf16>, vector<128x128xbf16>, vector<32x128xf32> -> vector<32x128xf32>
    %c0_11 = arith.constant 0 : index
    %c0_12 = arith.constant 0 : index
    %15 = vector.load %arg6[%c0_11, %c0_12] : memref<1x128xf32, #tpu.memory_space<vmem>>, vector<1x128xf32>
    %16 = vector.broadcast %15 : vector<1x128xf32> to vector<32x128xf32>
    %17 = arith.addf %14, %16 : vector<32x128xf32>
    %c0_13 = arith.constant 0 : index
    %c0_14 = arith.constant 0 : index
    %18 = vector.load %arg8[%c0_13, %c0_14] : memref<1x128xf32, #tpu.memory_space<vmem>>, vector<1x128xf32>
    %19 = vector.broadcast %18 : vector<1x128xf32> to vector<32x128xf32>
    %20 = arith.addf %17, %19 : vector<32x128xf32>
    %21 = vector.extract_strided_slice %11 {offsets = [0, 0], sizes = [32, 128], strides = [1, 1]} : vector<64x128xbf16> to vector<32x128xbf16>
    %c0_15 = arith.constant 0 : index
    %c0_16 = arith.constant 0 : index
    %c0_17 = arith.constant 0 : index
    %22 = vector.load %arg7[%c0_15, %c0_16, %c0_17] : memref<9x128x128xbf16, #tpu.memory_space<vmem>>, vector<1x128x128xbf16>
    %23 = vector.shape_cast %22 : vector<1x128x128xbf16> to vector<128x128xbf16>
    %cst_18 = arith.constant dense<0.000000e+00> : vector<32x128xf32>
    %24 = tpu.matmul %21, %23, %cst_18 {dimension_numbers = #tpu.dot_dimension_numbers<[1], [0], [0], [1], [0, 0, 1, 1], [], []>} : vector<32x128xbf16>, vector<128x128xbf16>, vector<32x128xf32> -> vector<32x128xf32>
    %25 = arith.addf %20, %24 : vector<32x128xf32>
    %26 = vector.extract_strided_slice %11 {offsets = [1, 0], sizes = [32, 128], strides = [1, 1]} : vector<64x128xbf16> to vector<32x128xbf16>
    %c1 = arith.constant 1 : index
    %c0_19 = arith.constant 0 : index
    %c0_20 = arith.constant 0 : index
    %27 = vector.load %arg7[%c1, %c0_19, %c0_20] : memref<9x128x128xbf16, #tpu.memory_space<vmem>>, vector<1x128x128xbf16>
    %28 = vector.shape_cast %27 : vector<1x128x128xbf16> to vector<128x128xbf16>
    %cst_21 = arith.constant dense<0.000000e+00> : vector<32x128xf32>
    %29 = tpu.matmul %26, %28, %cst_21 {dimension_numbers = #tpu.dot_dimension_numbers<[1], [0], [0], [1], [0, 0, 1, 1], [], []>} : vector<32x128xbf16>, vector<128x128xbf16>, vector<32x128xf32> -> vector<32x128xf32>
    %30 = arith.addf %25, %29 : vector<32x128xf32>
    %31 = vector.extract_strided_slice %11 {offsets = [2, 0], sizes = [32, 128], strides = [1, 1]} : vector<64x128xbf16> to vector<32x128xbf16>
    %c2 = arith.constant 2 : index
    %c0_22 = arith.constant 0 : index
    %c0_23 = arith.constant 0 : index
    %32 = vector.load %arg7[%c2, %c0_22, %c0_23] : memref<9x128x128xbf16, #tpu.memory_space<vmem>>, vector<1x128x128xbf16>
    %33 = vector.shape_cast %32 : vector<1x128x128xbf16> to vector<128x128xbf16>
    %cst_24 = arith.constant dense<0.000000e+00> : vector<32x128xf32>
    %34 = tpu.matmul %31, %33, %cst_24 {dimension_numbers = #tpu.dot_dimension_numbers<[1], [0], [0], [1], [0, 0, 1, 1], [], []>} : vector<32x128xbf16>, vector<128x128xbf16>, vector<32x128xf32> -> vector<32x128xf32>
    %35 = arith.addf %30, %34 : vector<32x128xf32>
    %36 = vector.extract_strided_slice %11 {offsets = [10, 0], sizes = [32, 128], strides = [1, 1]} : vector<64x128xbf16> to vector<32x128xbf16>
    %c3 = arith.constant 3 : index
    %c0_25 = arith.constant 0 : index
    %c0_26 = arith.constant 0 : index
    %37 = vector.load %arg7[%c3, %c0_25, %c0_26] : memref<9x128x128xbf16, #tpu.memory_space<vmem>>, vector<1x128x128xbf16>
    %38 = vector.shape_cast %37 : vector<1x128x128xbf16> to vector<128x128xbf16>
    %cst_27 = arith.constant dense<0.000000e+00> : vector<32x128xf32>
    %39 = tpu.matmul %36, %38, %cst_27 {dimension_numbers = #tpu.dot_dimension_numbers<[1], [0], [0], [1], [0, 0, 1, 1], [], []>} : vector<32x128xbf16>, vector<128x128xbf16>, vector<32x128xf32> -> vector<32x128xf32>
    %40 = arith.addf %35, %39 : vector<32x128xf32>
    %41 = vector.extract_strided_slice %11 {offsets = [11, 0], sizes = [32, 128], strides = [1, 1]} : vector<64x128xbf16> to vector<32x128xbf16>
    %c4 = arith.constant 4 : index
    %c0_28 = arith.constant 0 : index
    %c0_29 = arith.constant 0 : index
    %42 = vector.load %arg7[%c4, %c0_28, %c0_29] : memref<9x128x128xbf16, #tpu.memory_space<vmem>>, vector<1x128x128xbf16>
    %43 = vector.shape_cast %42 : vector<1x128x128xbf16> to vector<128x128xbf16>
    %cst_30 = arith.constant dense<0.000000e+00> : vector<32x128xf32>
    %44 = tpu.matmul %41, %43, %cst_30 {dimension_numbers = #tpu.dot_dimension_numbers<[1], [0], [0], [1], [0, 0, 1, 1], [], []>} : vector<32x128xbf16>, vector<128x128xbf16>, vector<32x128xf32> -> vector<32x128xf32>
    %45 = arith.addf %40, %44 : vector<32x128xf32>
    %46 = vector.extract_strided_slice %11 {offsets = [12, 0], sizes = [32, 128], strides = [1, 1]} : vector<64x128xbf16> to vector<32x128xbf16>
    %c5 = arith.constant 5 : index
    %c0_31 = arith.constant 0 : index
    %c0_32 = arith.constant 0 : index
    %47 = vector.load %arg7[%c5, %c0_31, %c0_32] : memref<9x128x128xbf16, #tpu.memory_space<vmem>>, vector<1x128x128xbf16>
    %48 = vector.shape_cast %47 : vector<1x128x128xbf16> to vector<128x128xbf16>
    %cst_33 = arith.constant dense<0.000000e+00> : vector<32x128xf32>
    %49 = tpu.matmul %46, %48, %cst_33 {dimension_numbers = #tpu.dot_dimension_numbers<[1], [0], [0], [1], [0, 0, 1, 1], [], []>} : vector<32x128xbf16>, vector<128x128xbf16>, vector<32x128xf32> -> vector<32x128xf32>
    %50 = arith.addf %45, %49 : vector<32x128xf32>
    %51 = vector.extract_strided_slice %11 {offsets = [20, 0], sizes = [32, 128], strides = [1, 1]} : vector<64x128xbf16> to vector<32x128xbf16>
    %c6 = arith.constant 6 : index
    %c0_34 = arith.constant 0 : index
    %c0_35 = arith.constant 0 : index
    %52 = vector.load %arg7[%c6, %c0_34, %c0_35] : memref<9x128x128xbf16, #tpu.memory_space<vmem>>, vector<1x128x128xbf16>
    %53 = vector.shape_cast %52 : vector<1x128x128xbf16> to vector<128x128xbf16>
    %cst_36 = arith.constant dense<0.000000e+00> : vector<32x128xf32>
    %54 = tpu.matmul %51, %53, %cst_36 {dimension_numbers = #tpu.dot_dimension_numbers<[1], [0], [0], [1], [0, 0, 1, 1], [], []>} : vector<32x128xbf16>, vector<128x128xbf16>, vector<32x128xf32> -> vector<32x128xf32>
    %55 = arith.addf %50, %54 : vector<32x128xf32>
    %56 = vector.extract_strided_slice %11 {offsets = [21, 0], sizes = [32, 128], strides = [1, 1]} : vector<64x128xbf16> to vector<32x128xbf16>
    %c7 = arith.constant 7 : index
    %c0_37 = arith.constant 0 : index
    %c0_38 = arith.constant 0 : index
    %57 = vector.load %arg7[%c7, %c0_37, %c0_38] : memref<9x128x128xbf16, #tpu.memory_space<vmem>>, vector<1x128x128xbf16>
    %58 = vector.shape_cast %57 : vector<1x128x128xbf16> to vector<128x128xbf16>
    %cst_39 = arith.constant dense<0.000000e+00> : vector<32x128xf32>
    %59 = tpu.matmul %56, %58, %cst_39 {dimension_numbers = #tpu.dot_dimension_numbers<[1], [0], [0], [1], [0, 0, 1, 1], [], []>} : vector<32x128xbf16>, vector<128x128xbf16>, vector<32x128xf32> -> vector<32x128xf32>
    %60 = arith.addf %55, %59 : vector<32x128xf32>
    %61 = vector.extract_strided_slice %11 {offsets = [22, 0], sizes = [32, 128], strides = [1, 1]} : vector<64x128xbf16> to vector<32x128xbf16>
    %c8 = arith.constant 8 : index
    %c0_40 = arith.constant 0 : index
    %c0_41 = arith.constant 0 : index
    %62 = vector.load %arg7[%c8, %c0_40, %c0_41] : memref<9x128x128xbf16, #tpu.memory_space<vmem>>, vector<1x128x128xbf16>
    %63 = vector.shape_cast %62 : vector<1x128x128xbf16> to vector<128x128xbf16>
    %cst_42 = arith.constant dense<0.000000e+00> : vector<32x128xf32>
    %64 = tpu.matmul %61, %63, %cst_42 {dimension_numbers = #tpu.dot_dimension_numbers<[1], [0], [0], [1], [0, 0, 1, 1], [], []>} : vector<32x128xbf16>, vector<128x128xbf16>, vector<32x128xf32> -> vector<32x128xf32>
    %65 = arith.addf %60, %64 : vector<32x128xf32>
    %cst_43 = arith.constant 0.000000e+00 : f32
    %66 = vector.broadcast %cst_43 : f32 to vector<32x128xf32>
    %67 = arith.maximumf %65, %66 : vector<32x128xf32>
    %c0_44 = arith.constant 0 : index
    %c0_45 = arith.constant 0 : index
    %68 = vector.load %arg9[%c0_44, %c0_45] : memref<32x128xf32, #tpu.memory_space<vmem>>, vector<32x128xf32>
    tpu.vector_store %arg9[%c0_44, %c0_45], %67 {strides = array<i32>} : memref<32x128xf32, #tpu.memory_space<vmem>>, vector<32x128xf32>,
    return
  }
  func.func @transform_0(%arg0: i32) -> (i32, i32) {
    %c0_i32 = arith.constant 0 : i32
    %c0_i32_0 = arith.constant 0 : i32
    return %arg0, %c0_i32 : i32, i32
  }
  func.func @transform_1(%arg0: i32) -> (i32, i32) {
    %c0_i32 = arith.constant 0 : i32
    %c0_i32_0 = arith.constant 0 : i32
    return %arg0, %c0_i32 : i32, i32
  }
  func.func @transform_2(%arg0: i32) -> (i32, i32) {
    %c0_i32 = arith.constant 0 : i32
    %c0_i32_0 = arith.constant 0 : i32
    %c0_i32_1 = arith.constant 0 : i32
    return %c0_i32, %c0_i32_0 : i32, i32
  }
  func.func @transform_3(%arg0: i32) -> (i32, i32) {
    %c0_i32 = arith.constant 0 : i32
    %c0_i32_0 = arith.constant 0 : i32
    %c0_i32_1 = arith.constant 0 : i32
    return %c0_i32, %c0_i32_0 : i32, i32
  }
  func.func @transform_4(%arg0: i32) -> (i32, i32) {
    %c0_i32 = arith.constant 0 : i32
    %c0_i32_0 = arith.constant 0 : i32
    %c0_i32_1 = arith.constant 0 : i32
    return %c0_i32, %c0_i32_0 : i32, i32
  }
  func.func @transform_5(%arg0: i32) -> (i32, i32) {
    %c0_i32 = arith.constant 0 : i32
    %c0_i32_0 = arith.constant 0 : i32
    %c0_i32_1 = arith.constant 0 : i32
    return %c0_i32, %c0_i32_0 : i32, i32
  }
  func.func @transform_6(%arg0: i32) -> (i32, i32, i32) {
    %c0_i32 = arith.constant 0 : i32
    %c0_i32_0 = arith.constant 0 : i32
    %c0_i32_1 = arith.constant 0 : i32
    %c0_i32_2 = arith.constant 0 : i32
    return %c0_i32, %c0_i32_0, %c0_i32_1 : i32, i32, i32
  }
  func.func @transform_7(%arg0: i32) -> (i32, i32) {
    %c0_i32 = arith.constant 0 : i32
    %c0_i32_0 = arith.constant 0 : i32
    %c0_i32_1 = arith.constant 0 : i32
    return %c0_i32, %c0_i32_0 : i32, i32
  }
  func.func @transform_8(%arg0: i32) -> (i32, i32) {
    %c0_i32 = arith.constant 0 : i32
    %c0_i32_0 = arith.constant 0 : i32
    return %arg0, %c0_i32 : i32, i32
  }
}

</mosaic_0001>

<bundles_post_ra>
// kernel: model_forward.2
= control target key start
LH: loop header
LB: loop body
LE: loop exit
PB: predicated region body
PF: predicated region fallthrough
CT: control target
= control target key end

     0   :  { %s2784_s27 = smov 0   ;;  %s3199_s0 = inlined_call_operand.vmem [shape: bf16[512,128], index: 0, kind: input, shape index: {}]   ;;  %s3200_s1 = inlined_call_operand.vmem [shape: f32[512,1], index: 1, kind: input, shape index: {}]   ;;  %s3201_s2 = inlined_call_operand.vmem [shape: bf16[128,128], index: 2, kind: input, shape index: {}]   ;;  %s3202_s3 = inlined_call_operand.vmem [shape: f32[1,128], index: 3, kind: input, shape index: {}]   ;;  %s3203_s4 = inlined_call_operand.vmem [shape: bf16[128,128], index: 4, kind: input, shape index: {}]   ;;  %s3204_s5 = inlined_call_operand.vmem [shape: f32[1,128], index: 5, kind: input, shape index: {}]   ;;  %s3205_s6 = inlined_call_operand.vmem [shape: bf16[9,128,128], index: 6, kind: input, shape index: {}]   ;;  %s3206_s7 = inlined_call_operand.vmem [shape: f32[1,128], index: 7, kind: input, shape index: {}]   ;;  %s3207_s8 = inlined_call_operand.vmem [shape: bf16[256,128], index: 8, kind: output, shape index: {}]  }
   0x1 LB: > { %s1986_s28 = sadd.s32 4294967295, %s2736_s27   ;;  %p1990_p0 = scmp.ge.s32.totalorder %s2736_s27, 1  ;;  %s2736_s27 = sphi %s2784_s27, %s18_s27  }
   0x2   : > { %p274_p1 = scmp.lt.s32.totalorder %s2736_s27, 9 }
   0x4   : > { %p275_p2 = pnand %p1990_p0, %p274_p1 }
   0x5   : > { %v2635_v0 = vld [vmem:[%s3201_s2] sm:$0xff] (!%p275_p2)   ;;  %s1991_s9 = sshll.u32 (!%p275_p2), %s1986_s28, 3  ;;  %v2636_v1 = vld [vmem:[%s3201_s2 + $0x8] sm:$0xff] (!%p275_p2)   ;;  %v2738_v2 = vmov (!%p275_p2), 0   ;;  %v2637_v3 = vld [vmem:[%s3201_s2 + $0x10] sm:$0xff] (!%p275_p2)   ;;  %vm1135_vm1 = vcmask (!%p275_p2), 1042432  }
   0x6   : > { %278 = sbr.rel (%p275_p2) target bundleno = 654 (0x28e), region = 52  ;;  %p314_p3 = scmp.lt.s32.totalorder (!%p275_p2), %s1991_s9, 63  ;;  %2356 = vmatprep.subr.bf16.mxu0 (!%p275_p2), %v2635_v0  ;;  %2634 = vset.pattern.permute.xlu1 (!%p275_p2), %v2738_v2  ;;  %v2638_v4 = vld [vmem:[%s3201_s2 + $0x18] sm:$0xff] (!%p275_p2)   ;;  %v2639_v10 = vld [vmem:[%s3201_s2 + $0x20] sm:$0xff] (!%p275_p2)   ;;  %v2640_v12 = vld [vmem:[%s3201_s2 + $0x28] sm:$0xff] (!%p275_p2)   ;;  %vm1009_vm3 = vcmask (!%p275_p2), 1046528  }
   0x7   : > { %2357 = vmatpush3.bf16.msra.mxu0 (!%p275_p2), %v2635_v0  ;;  %2633 = vset.pattern.permute.xlu0 (!%p275_p2), %v2738_v2  ;;  %v2641_v22 = vld [vmem:[%s3201_s2 + $0x30] sm:$0xff] (!%p275_p2)   ;;  %v2642_v27 = vld [vmem:[%s3201_s2 + $0x38] sm:$0xff] (!%p275_p2)   ;;  %v2661_v36 = vld [vmem:[%s3205_s6 + $0xc0] sm:$0xff] (!%p275_p2)   ;;  %vm594_vm0 = vsmask.f32 (!%p275_p2), 6400  ;;  %vm1395_vm5 = vcmask (!%p275_p2), 1041408  }
   0x8   : > { %2358 = vmatprep.subr.bf16.mxu0 (!%p275_p2), %v2636_v1  ;;  %v2650_v38 = vld [vmem:[%s3203_s4] sm:$0xff] (!%p275_p2)   ;;  %2460 = vmatprep.subr.bf16.mxu1 (!%p275_p2), %v2661_v36  ;;  %v2663_v40 = vld [vmem:[%s3205_s6 + $0xc8] sm:$0xff] (!%p275_p2)   ;;  %v2665_v44 = vld [vmem:[%s3205_s6 + $0xd0] sm:$0xff] (!%p275_p2)   ;;  %vm865_vm2 = vsmask.f32 (!%p275_p2), 7424  ;;  %vm1522_vm6 = vcmask (!%p275_p2), 1045504  }
   0x9   : > { %2461 = vmatpush3.bf16.msra.mxu1 (!%p275_p2), %v2661_v36  ;;  %v2651_v42 = vld [vmem:[%s3203_s4 + $0x8] sm:$0xff] (!%p275_p2)   ;;  %v2652_v46 = vld [vmem:[%s3203_s4 + $0x10] sm:$0xff] (!%p275_p2)   ;;  %v2653_v50 = vld [vmem:[%s3203_s4 + $0x18] sm:$0xff] (!%p275_p2)   ;;  %vm1261_vm4 = vsmask.f32 (!%p275_p2), 2304  ;;  %vm1785_vm7 = vcmask (!%p275_p2), 1044480  }
   0xa   : > { %2462 = vmatprep.subr.bf16.mxu1 (!%p275_p2), %v2663_v40  ;;  %v2654_v52 = vld [vmem:[%s3203_s4 + $0x20] sm:$0xff] (!%p275_p2)   ;;  %v2655_v53 = vld [vmem:[%s3203_s4 + $0x28] sm:$0xff] (!%p275_p2)   ;;  %v2656_v54 = vld [vmem:[%s3203_s4 + $0x30] sm:$0xff] (!%p275_p2)   ;;  %vm1648_vm8 = vsmask.f32 (!%p275_p2), 5376  ;;  %s1995_s19 = sshll.u32 (!%p275_p2), %s1986_s28, 2 }
   0xb   : > { %2359 = vmatpush3.bf16.msra.mxu0 (!%p275_p2), %v2636_v1  ;;  %v2657_v55 = vld [vmem:[%s3203_s4 + $0x38] sm:$0xff] (!%p275_p2)   ;;  %v2658_v56 = vld [vmem:[%s3205_s6] sm:$0xff] (!%p275_p2)   ;;  %v2659_v58 = vld [vmem:[%s3205_s6 + $0x8] sm:$0xff] (!%p275_p2)   ;;  %p326_p4 = scmp.lt.s32.totalorder (!%p275_p2), %s1995_s19, 31 }
   0xc   : > { %2360 = vmatprep.subr.bf16.mxu0 (!%p275_p2), %v2637_v3  ;;  %v2660_v60 = vld [vmem:[%s3205_s6 + $0x10] sm:$0xff] (!%p275_p2)   ;;  %v2662_v61 = vld [vmem:[%s3205_s6 + $0x18] sm:$0xff] (!%p275_p2)   ;;  %v2664_v62 = vld [vmem:[%s3205_s6 + $0x20] sm:$0xff] (!%p275_p2)  }
   0xd   : > { %s3209_s9 = smov (!%p314_p3, %s1991_s9), 63  ;;  %2463 = vmatpush3.bf16.msra.mxu1 %v2663_v40  ;;  %v2666_v63 = vld [vmem:[%s3205_s6 + $0x28] sm:$0xff]   ;;  %v2667_v0 = vld [vmem:[%s3205_s6 + $0xd8] sm:$0xff]   ;;  %v2668_v1 = vld [vmem:[%s3205_s6 + $0x30] sm:$0xff]   ;;  %s3211_s19 = smov (!%p326_p4, %s1995_s19), 31 }
   0xe   : > { %s1992_s14 = sshll.u32 %s3209_s9, 2  ;;  %s1994_s18 = sshll.u32 %s3209_s9, 3  ;;  %2464 = vmatprep.subr.bf16.mxu1 %v2665_v44  ;;  %v2669_v2 = vld [vmem:[%s3205_s6 + $0xe0] sm:$0xff]  }
   0xf   : > { %s2806_s17 = scalar_lea.vmem %s3199_s0, %s1992_s14  ;;  %s2816_s23 = scalar_lea.vmem %s3200_s1, %s1994_s18  ;;  %2361 = vmatpush3.bf16.msra.mxu0 %v2637_v3  ;;  %v2670_v3 = vld [vmem:[%s3205_s6 + $0x38] sm:$0xff]  }
  0x10   : > { %v332_v5 = vld [vmem:[%s2806_s17] sm:$0xf]  ;;  %v333_v6 = vld [vmem:[%s2806_s17 + $0x4] sm:$0xf]  ;;  %v510_v8 = vld [vmem:[%s2816_s23 + $0x10] sm:$0xff]  ;;  %2362 = vmatprep.subr.bf16.mxu0 %v2638_v4  ;;  %s1996_s20 = sshll.u32 %s3211_s19, 2 }
  0x11   : > { %v1998_v7 = vcombine.low %v332_v5, %v333_v6  ;;  %v508_v9 = vld [vmem:[%s2816_s23] sm:$0xff]  ;;  %528 = vperm.xlu1 %2634, %v510_v8   ;;  %v511_v11 = vld [vmem:[%s2816_s23 + $0x18] sm:$0xff]  ;;  %v509_v13 = vld [vmem:[%s2816_s23 + $0x8] sm:$0xff]  ;;  %2465 = vmatpush3.bf16.msra.mxu1 %v2665_v44  ;;  %s329_s22 = scalar_lea.vmem %s3207_s8, %s1996_s20 }
  0x12   : > { %518 = vperm.xlu0 %2633, %v508_v9   ;;  %v334_v14 = vld [vmem:[%s2806_s17 + $0x8] sm:$0xf]  ;;  %v337_v16 = vld [vmem:[%s2806_s17 + $0x14] sm:$0xf]  ;;  %v335_v17 = vld [vmem:[%s2806_s17 + $0xc] sm:$0xf]  ;;  %2466 = vmatprep.subr.bf16.mxu1 %v2667_v0 }
  0x13   : > { %2372 = vmatprep.mubr.bf16.mxu0 %v1998_v7  ;;  %2363 = vmatpush3.bf16.msra.mxu0 %v2638_v4  ;;  %v2011_v15 = vcombine.low %v333_v6, %v334_v14  ;;  %v513_v18 = vld [vmem:[%s2816_s23 + $0x28] sm:$0xff]  ;;  %v2013_v19 = vcombine.low %v337_v16, %v337_v16  ;;  %v512_v20 = vld [vmem:[%s2816_s23 + $0x20] sm:$0xff]  ;;  %v336_v21 = vld [vmem:[%s2806_s17 + $0x10] sm:$0xf]  ;;  %v1999_v41 = vcombine.low %v334_v14, %v335_v17 }
  0x14   : > { %2364 = vmatprep.subr.bf16.mxu0 %v2639_v10  ;;  %v2012_v24 = vcombine.low %v335_v17, %v336_v21  ;;  %v515_v26 = vld [vmem:[%s2816_s23 + $0x38] sm:$0xff]  ;;  %v514_v30 = vld [vmem:[%s2816_s23 + $0x30] sm:$0xff]  ;;  %v2000_v45 = vcombine.low %v336_v21, %v337_v16  ;;  %v2671_v4 = vld [vmem:[%s3205_s6 + $0xe8] sm:$0xff]  }
  0x15   : > { %533 = vperm.xlu1 %2634, %v511_v11   ;;  %v596_v23 = vshrl.u32 %v2011_v15, 16  ;;  %v599_v25 = vshll.u32 %v2011_v15, 16  ;;  %v613_v28 = vshrl.u32 %v2013_v19, 16  ;;  %v616_v29 = vshll.u32 %v2013_v19, 16  ;;  %v2649_v47 = vld [vmem:[%s2806_s17 + $0x18] sm:$0xff]   ;;  %2467 = vmatpush3.bf16.msra.mxu1 %v2667_v0  ;;  %v2914_v5 = vld [vmem:[%s3205_s6 + $0x40] sm:$0xff]  }
  0x16   : > { %523 = vperm.xlu0 %2633, %v509_v13   ;;  %v604_v31 = vshrl.u32 %v2012_v24, 16  ;;  %v607_v32 = vshll.u32 %v2012_v24, 16  ;;  %2468 = vmatprep.subr.bf16.mxu1 %v2669_v2  ;;  %v2673_v6 = vld [vmem:[%s3205_s6 + $0xf0] sm:$0xff]   ;;  %v2675_v7 = vld [vmem:[%s3205_s6 + $0xf8] sm:$0xff]   ;;  %v2926_v8 = vld [vmem:[%s3205_s6 + $0x100] sm:$0xff]  }
  0x17   : > { %2365 = vmatpush3.bf16.msra.mxu0 %v2639_v10  ;;  %v598_v33 = vrot.slane %v596_v23, 1  ;;  %v601_v34 = vrot.slane %v599_v25, 2  ;;  %v615_v35 = vrot.slane %v613_v28, 1  ;;  %v618_v37 = vrot.slane %v616_v29, 2  ;;  %v1997_v11 = vld [vmem:[%s3202_s3] ss:$0 sm:$0xff] }
  0x18   : > { %2366 = vmatprep.subr.bf16.mxu0 %v2640_v12  ;;  %v606_v39 = vrot.slane %v604_v31, 1  ;;  %v609_v43 = vrot.slane %v607_v32, 2 }
  0x19   : > { %543 = vperm.xlu1 %2634, %v513_v18   ;;  %v602_v48 = vor.u32 %v601_v34, %v598_v33  ;;  %v619_v57 = vor.u32 %v618_v37, %v615_v35  ;;  %2469 = vmatpush3.bf16.msra.mxu1 %v2669_v2 }
  0x1a   : > { %538 = vperm.xlu0 %2633, %v512_v20   ;;  %v610_v49 = vor.u32 %v609_v43, %v606_v39  ;;  %2470 = vmatprep.subr.bf16.mxu1 %v2671_v4  ;;  %v2674_v43 = vld [vmem:[%s3205_s6 + $0x48] sm:$0xff]  }
  0x1b   : > { %2367 = vmatpush3.bf16.msra.mxu0 %v2640_v12 }
  0x1c   : > { %2368 = vmatprep.subr.bf16.mxu0 %v2641_v22  ;;  %v611_v51 = vsel %vm594_vm0, %v602_v48, %v610_v49  ;;  %v620_v59 = vsel %vm594_vm0, %v610_v49, %v619_v57 }
  0x1d   : > { %553 = vperm.xlu1 %2634, %v515_v26   ;;  %2471 = vmatpush3.bf16.msra.mxu1 %v2671_v4 }
  0x1e   : > { %548 = vperm.xlu0 %2633, %v514_v30   ;;  %2472 = vmatprep.subr.bf16.mxu1 %v2673_v6 }
  0x1f   : > { %2369 = vmatpush3.bf16.msra.mxu0 %v2641_v22 }
  0x20   : > { %2370 = vmatprep.subr.bf16.mxu0 %v2642_v27 }
  0x21   : > { %2473 = vmatpush3.bf16.msra.mxu1 %v2673_v6 }
  0x22   : > { %2474 = vmatprep.subr.bf16.mxu1 %v2675_v7 }
  0x23   : > { %2371 = vmatpush3.bf16.msra.mxu0 %v2642_v27 }
  0x24   : > { %2380 = vmatprep.subr.bf16.mxu0 %v2650_v38 }
  0x25   : > { %2475 = vmatpush3.bf16.msra.mxu1 %v2675_v7 }
  0x26   : > { %2373 = vmatmul.mubr.bf16.vlgmr.msra.gmra.mrb[0].mxu0 %v1999_v41  ;;  %2480 = vmatprep.subr.bf16.mxu1 %v2926_v8 }
  0x27   : > { %2376 = vmatprep.mubr.bf16.mxu0 %v2000_v45  ;;  %2381 = vmatpush3.bf16.msra.mxu0 %v2650_v38 }
  0x28   : > { %2382 = vmatprep.subr.bf16.mxu0 %v2651_v42 }
  0x2b   : > { %2383 = vmatpush3.bf16.msra.mxu0 %v2651_v42 }
  0x2c   : > { %2384 = vmatprep.subr.bf16.mxu0 %v2652_v46 }
  0x2e   : > { %2377 = vmatmul.mubr.bf16.gmra.mrb[4].mxu0 %v2649_v47 }
  0x2f   : > { %2385 = vmatpush3.bf16.msra.mxu0 %v2652_v46  ;;  %2396 = vmatprep.mubr.bf16.mxu0 %v611_v51 }
  0x30   : > { %2386 = vmatprep.subr.bf16.mxu0 %v2653_v50 }
  0x33   : > { %2387 = vmatpush3.bf16.msra.mxu0 %v2653_v50 }
  0x34   : > { %2388 = vmatprep.subr.bf16.mxu0 %v2654_v52 }
  0x37   : > { %2389 = vmatpush3.bf16.msra.mxu0 %v2654_v52 }
  0x38   : > { %2390 = vmatprep.subr.bf16.mxu0 %v2655_v53 }
  0x3b   : > { %2391 = vmatpush3.bf16.msra.mxu0 %v2655_v53 }
  0x3c   : > { %2392 = vmatprep.subr.bf16.mxu0 %v2656_v54 }
  0x3f   : > { %2393 = vmatpush3.bf16.msra.mxu0 %v2656_v54 }
  0x40   : > { %2394 = vmatprep.subr.bf16.mxu0 %v2657_v55 }
  0x43   : > { %2395 = vmatpush3.bf16.msra.mxu0 %v2657_v55 }
  0x44   : > { %2400 = vmatprep.subr.bf16.mxu0 %v2658_v56 }
  0x46   : > { %2397 = vmatmul.mubr.bf16.vlgmr.msra.gmra.mrb[8].mxu0 %v620_v59 }
  0x47   : > { %2401 = vmatpush3.bf16.msra.mxu0 %v2658_v56 }
  0x48   : > { %2402 = vmatprep.subr.bf16.mxu0 %v2659_v58 }
  0x4b   : > { %2403 = vmatpush3.bf16.msra.mxu0 %v2659_v58 }
  0x4c   : > { %2404 = vmatprep.subr.bf16.mxu0 %v2660_v60 }
  0x4f   : > { %2405 = vmatpush3.bf16.msra.mxu0 %v2660_v60 }
  0x50   : > { %2406 = vmatprep.subr.bf16.mxu0 %v2662_v61 }
  0x53   : > { %2407 = vmatpush3.bf16.msra.mxu0 %v2662_v61  ;;  %v2676_v61 = vld [vmem:[%s3205_s6 + $0x50] sm:$0xff]  }
  0x54   : > { %2408 = vmatprep.subr.bf16.mxu0 %v2664_v62 }
  0x57   : > { %2409 = vmatpush3.bf16.msra.mxu0 %v2664_v62 }
  0x58   : > { %2410 = vmatprep.subr.bf16.mxu0 %v2666_v63 }
  0x5b   : > { %2411 = vmatpush3.bf16.msra.mxu0 %v2666_v63 }
  0x5c   : > { %2412 = vmatprep.subr.bf16.mxu0 %v2668_v1 }
  0x5f   : > { %2413 = vmatpush3.bf16.msra.mxu0 %v2668_v1 }
  0x60   : > { %2414 = vmatprep.subr.bf16.mxu0 %v2670_v3 }
  0x63   : > { %2415 = vmatpush3.bf16.msra.mxu0 %v2670_v3 }
  0x64   : > { %2420 = vmatprep.subr.bf16.mxu0 %v2914_v5 }
  0x90   : > { %v529_v10 = vpop.permute.xlu1 %528 }
  0x91   : > { %v519_v9 = vpop.permute.xlu0 %518 }
  0x94   : > { %v534_v16 = vpop.permute.xlu1 %533 }
  0x95   : > { %v524_v12 = vpop.permute.xlu0 %523 }
  0x98   : > { %v544_v30 = vpop.permute.xlu1 %543 }
  0x99   : > { %v539_v25 = vpop.permute.xlu0 %538 }
  0x9c   : > { %v554_v54 = vpop.permute.xlu1 %553 }
  0x9d   : > { %v549_v45 = vpop.permute.xlu0 %548 }
  0xf9   : > { %v2374_v13 = vpop.f32.mrb[0].mxu0 }
  0xfa   : > { %v478_v14 = vadd.f32 %v2374_v13, %v1997_v11  ;;  %v469_v15 = vpop.f32.mrb[1].mxu0 }
  0xfb   : > { %v470_v17 = vadd.f32 %v1997_v11, %v469_v15  ;;  %v2375_v18 = vpop.f32.mrb[2].mxu0 }
  0xfc   : > { %v502_v19 = vmax.f32 %v478_v14, 0.0  ;;  %v481_v20 = vadd.f32 %v2375_v18, %v1997_v11  ;;  %v472_v21 = vpop.f32.mrb[3].mxu0  ;;  %v2678_v14 = vld [vmem:[%s3205_s6 + $0x58] sm:$0xff]  }
  0xfd   : > { %v500_v22 = vmax.f32 %v470_v17, 0.0  ;;  %v473_v23 = vadd.f32 %v1997_v11, %v472_v21 }
  0xfe   : > { %v503_v24 = vmax.f32 %v481_v20, 0.0  ;;  %v558_v27 = vmul.f32 %v529_v10, %v502_v19 }
  0xff   : > { %v501_v26 = vmax.f32 %v473_v23, 0.0  ;;  %v556_v29 = vmul.f32 %v519_v9, %v500_v22  ;;  %v2679_v22 = vld [vmem:[%s3205_s6 + $0x108] sm:$0xff]  }
 0x100   : > { %v559_v28 = vmul.f32 %v534_v16, %v503_v24 }
 0x101   : > { %v557_v31 = vmul.f32 %v524_v12, %v501_v26  ;;  %v2378_v32 = vpop.f32.mrb[4].mxu0 }
 0x102   : > { %v2932_v33 = vpack.c.bf16 %v559_v28, %v558_v27  ;;  %v494_v34 = vadd.f32 %v2378_v32, %v1997_v11  ;;  %v485_v35 = vpop.f32.mrb[5].mxu0 }
 0x103   : > { %v2934_v36 = vpack.c.bf16 %v557_v31, %v556_v29  ;;  %v486_v37 = vadd.f32 %v1997_v11, %v485_v35  ;;  %v2379_v38 = vpop.f32.mrb[6].mxu0  ;;  %v2680_v31 = vld [vmem:[%s3205_s6 + $0x60] sm:$0xff]  }
 0x104   : > { %v506_v39 = vmax.f32 %v494_v34, 0.0  ;;  %v497_v40 = vadd.f32 %v2379_v38, %v1997_v11  ;;  %v488_v41 = vpop.f32.mrb[7].mxu0  ;;  %v1137_v42 = vrot.slane %v2932_v33, 5  ;;  %v2941_v44 = vshll.u32 %v2932_v33, 16 }
 0x105   : > { %v504_v46 = vmax.f32 %v486_v37, 0.0  ;;  %v489_v47 = vadd.f32 %v1997_v11, %v488_v41  ;;  %2416 = vmatprep.mubr.bf16.mxu0 %v2934_v36  ;;  %v1136_v48 = vrot.slane %v2934_v36, 5  ;;  %v867_v49 = vshrl.u32 %v2934_v36, 16  ;;  %v2681_v41 = vld [vmem:[%s3205_s6 + $0x110] sm:$0xff]  }
 0x106   : > { %v562_v50 = vmul.f32 %v549_v45, %v506_v39  ;;  %v507_v51 = vmax.f32 %v497_v40, 0.0  ;;  %2417 = vmatmul.mubr.bf16.vlgmr.msra.gmra.mrb[8].mxu0 %v2932_v33  ;;  %v869_v52 = vshll.u32 %v2934_v36, 16  ;;  %v876_v53 = vrot.slane %v2941_v44, 1 }
 0x107   : > { %v560_v55 = vmul.f32 %v539_v25, %v504_v46  ;;  %v505_v56 = vmax.f32 %v489_v47, 0.0  ;;  %2421 = vmatpush3.bf16.msra.mxu0 %v2914_v5  ;;  %v1138_v57 = vsel %vm1135_vm1, %v1136_v48, %v1137_v42  ;;  %v2952_v58 = vshrl.u32 %v2932_v33, 16 }
 0x108   : > { %v563_v59 = vmul.f32 %v554_v54, %v507_v51  ;;  %2476 = vmatprep.mubr.bf16.mxu1 %v1138_v57  ;;  %2422 = vmatprep.subr.bf16.mxu0 %v2674_v43  ;;  %v871_v60 = vrot.slane %v869_v52, 1  ;;  %v1262_v62 = vrot.slane %v867_v49, 5  ;;  %v1263_v63 = vrot.slane %v869_v52, 6 }
 0x109   : > { %v561_v0 = vmul.f32 %v544_v30, %v505_v56  ;;  %v1265_v1 = vrot.slane %v2952_v58, 5  ;;  %v1266_v2 = vrot.slane %v2941_v44, 6  ;;  %v880_v3 = vor.u32 %v2952_v58, %v876_v53 }
 0x10a   : > { %v2960_v4 = vpack.c.bf16 %v563_v59, %v562_v50  ;;  %v872_v5 = vor.u32 %v871_v60, %v867_v49  ;;  %v1264_v6 = vor.u32 %v1263_v63, %v1262_v62  ;;  %v1010_v7 = vrot.slane %v2934_v36, 1  ;;  %v2684_v59 = vld [vmem:[%s3205_s6 + $0x70] sm:$0xff]   ;;  %v2686_v62 = vld [vmem:[%s3205_s6 + $0x78] sm:$0xff]   ;;  %v2687_v63 = vld [vmem:[%s3205_s6 + $0x128] sm:$0xff]  }
 0x10b   : > { %v2963_v9 = vpack.c.bf16 %v561_v0, %v560_v55  ;;  %2423 = vmatpush3.bf16.msra.mxu0 %v2674_v43  ;;  %v1267_v10 = vor.u32 %v1266_v2, %v1265_v1  ;;  %v1011_v11 = vrot.slane %v2932_v33, 1  ;;  %v1396_v12 = vrot.slane %v2934_v36, 6  ;;  %v2688_v0 = vld [vmem:[%s3205_s6 + $0x80] sm:$0xff]   ;;  %v2689_v1 = vld [vmem:[%s3205_s6 + $0x130] sm:$0xff]   ;;  %v2690_v2 = vld [vmem:[%s3205_s6 + $0x88] sm:$0xff]  }
 0x10c   : > { %v877_v13 = vsel %vm865_vm2, %v872_v5, %v876_v53  ;;  %2424 = vmatprep.subr.bf16.mxu0 %v2676_v61  ;;  %v1397_v15 = vrot.slane %v2932_v33, 6  ;;  %v1523_v16 = vrot.slane %v2932_v33, 2  ;;  %v1526_v17 = vrot.slane %v2960_v4, 2  ;;  %v2693_v5 = vld [vmem:[%s3205_s6 + $0x140] sm:$0xff]  }
 0x10d   : > { %2436 = vmatprep.mubr.bf16.mxu0 %v877_v13  ;;  %v1139_v18 = vrot.slane %v2963_v9, 5  ;;  %v1268_v19 = vsel %vm1261_vm4, %v1264_v6, %v1267_v10  ;;  %v882_v20 = vshll.u32 %v2963_v9, 16  ;;  %v2978_v21 = vsel %vm1009_vm3, %v1010_v7, %v1011_v11  ;;  %v2694_v6 = vld [vmem:[%s3205_s6 + $0x98] sm:$0xff]   ;;  %v2695_v7 = vld [vmem:[%s3205_s6 + $0x148] sm:$0xff]   ;;  %v2700_v13 = vld [vmem:[%s3205_s6 + $0xb0] sm:$0xff]  }
 0x10e   : > { %v1269_v23 = vshrl.u32 %v2963_v9, 16  ;;  %v2985_v24 = vsel %vm1395_vm5, %v1396_v12, %v1397_v15  ;;  %v1013_v25 = vrot.slane %v2963_v9, 1  ;;  %v1399_v26 = vrot.slane %v2963_v9, 6  ;;  %v2699_v12 = vld [vmem:[%s3205_s6 + $0x158] sm:$0xff]  }
 0x10f   : > { %2425 = vmatpush3.bf16.msra.mxu0 %v2676_v61  ;;  %v1140_v27 = vsel %vm1135_vm1, %v1137_v42, %v1139_v18  ;;  %v884_v28 = vrot.slane %v882_v20, 1  ;;  %v1272_v29 = vrot.slane %v882_v20, 6  ;;  %v1524_v30 = vrot.slane %v2963_v9, 2  ;;  %v2685_v61 = vld [vmem:[%s3205_s6 + $0x120] sm:$0xff]   ;;  %v2705_v18 = vld [vmem:[%s3205_s6 + $0x178] sm:$0xff]  }
 0x110   : > { %2477 = vmatmul.mubr.bf16.vlgmr.msra.gmra.mrb[0].mxu1 %v1140_v27  ;;  %2426 = vmatprep.subr.bf16.mxu0 %v2678_v14  ;;  %v1271_v32 = vrot.slane %v1269_v23, 5  ;;  %v2995_v34 = vsel %vm1009_vm3, %v1011_v11, %v1013_v25  ;;  %v2998_v35 = vsel %vm1395_vm5, %v1397_v15, %v1399_v26  ;;  %v1649_v36 = vrot.slane %v2952_v58, 2  ;;  %v2698_v11 = vld [vmem:[%s3205_s6 + $0xa8] sm:$0xff]   ;;  %v2702_v15 = vld [vmem:[%s3205_s6 + $0xb8] sm:$0xff]   ;;  %v2712_v25 = vld [vmem:[%s3205_s6 + $0x1b0] sm:$0xff]  }
 0x111   : > { %2481 = vmatpush3.bf16.msra.mxu1 %v2926_v8  ;;  %2496 = vmatprep.mubr.bf16.mxu1 %v1268_v19  ;;  %v885_v37 = vsel %vm865_vm2, %v880_v3, %v884_v28  ;;  %v3004_v38 = vsel %vm1522_vm6, %v1523_v16, %v1524_v30  ;;  %v3007_v39 = vsel %vm1522_vm6, %v1524_v30, %v1526_v17  ;;  %v1650_v40 = vrot.slane %v2941_v44, 3  ;;  %v2682_v44 = vld [vmem:[%s3205_s6 + $0x68] sm:$0xff]   ;;  %v2691_v3 = vld [vmem:[%s3205_s6 + $0x138] sm:$0xff]   ;;  %v2704_v17 = vld [vmem:[%s3205_s6 + $0x170] sm:$0xff]  }
 0x112   : > { %2482 = vmatprep.subr.bf16.mxu1 %v2679_v22  ;;  %v1273_v42 = vor.u32 %v1272_v29, %v1271_v32  ;;  %v1652_v43 = vrot.slane %v1269_v23, 2  ;;  %v1653_v45 = vrot.slane %v882_v20, 3  ;;  %v1657_v8 = vshrl.u32 %v2960_v4, 16  ;;  %v2703_v16 = vld [vmem:[%s3205_s6 + $0x168] sm:$0xff]   ;;  %v2706_v19 = vld [vmem:[%s3205_s6 + $0x180] sm:$0xff]   ;;  %v2713_v26 = vld [vmem:[%s3205_s6 + $0x1b8] sm:$0xff]  }
 0x113   : > { %2427 = vmatpush3.bf16.msra.mxu0 %v2678_v14  ;;  %v1651_v46 = vor.u32 %v1650_v40, %v1649_v36  ;;  %v1660_v47 = vshll.u32 %v2960_v4, 16  ;;  %v1786_v48 = vrot.slane %v2932_v33, 3  ;;  %v1787_v49 = vrot.slane %v2963_v9, 3  ;;  %v2683_v33 = vld [vmem:[%s3205_s6 + $0x118] sm:$0xff]   ;;  %v2696_v9 = vld [vmem:[%s3205_s6 + $0xa0] sm:$0xff]   ;;  %v2707_v20 = vld [vmem:[%s3205_s6 + $0x188] sm:$0xff]  }
 0x114   : > { %2428 = vmatprep.subr.bf16.mxu0 %v2680_v31  ;;  %v1274_v50 = vsel %vm1261_vm4, %v1267_v10, %v1273_v42  ;;  %v1654_v51 = vor.u32 %v1653_v45, %v1652_v43  ;;  %v1659_v52 = vrot.slane %v1657_v8, 2  ;;  %v1789_v53 = vrot.slane %v2960_v4, 3  ;;  %v2692_v4 = vld [vmem:[%s3205_s6 + $0x90] sm:$0xff]   ;;  %v2701_v14 = vld [vmem:[%s3205_s6 + $0x160] sm:$0xff]   ;;  %v2715_v28 = vld [vmem:[%s3205_s6 + $0x1c8] sm:$0xff]  }
 0x115   : > { %2483 = vmatpush3.bf16.msra.mxu1 %v2679_v22  ;;  %v1662_v54 = vrot.slane %v1660_v47, 3  ;;  %v3023_v55 = vsel %vm1785_vm7, %v1786_v48, %v1787_v49  ;;  %v2697_v10 = vld [vmem:[%s3205_s6 + $0x150] sm:$0xff]   ;;  %v2709_v22 = vld [vmem:[%s3205_s6 + $0x198] sm:$0xff]   ;;  %v2710_v23 = vld [vmem:[%s3205_s6 + $0x1a0] sm:$0xff]  }
 0x116   : > { %2484 = vmatprep.subr.bf16.mxu1 %v2681_v41  ;;  %v3029_v56 = vsel %vm1648_vm8, %v1651_v46, %v1654_v51  ;;  %v3032_v57 = vsel %vm1785_vm7, %v1787_v49, %v1789_v53  ;;  %v2714_v27 = vld [vmem:[%s3205_s6 + $0x1c0] sm:$0xff]   ;;  %v2716_v29 = vld [vmem:[%s3205_s6 + $0x1d0] sm:$0xff]   ;;  %v2717_v30 = vld [vmem:[%s3205_s6 + $0x1d8] sm:$0xff]  }
 0x117   : > { %2429 = vmatpush3.bf16.msra.mxu0 %v2680_v31  ;;  %v1663_v58 = vor.u32 %v1662_v54, %v1659_v52  ;;  %v2718_v31 = vld [vmem:[%s3205_s6 + $0x1e0] sm:$0xff]   ;;  %v2719_v32 = vld [vmem:[%s3205_s6 + $0x1e8] sm:$0xff]   ;;  %v2728_v42 = vld [vmem:[%s3205_s6 + $0x230] sm:$0xff]  }
 0x118   : > { %2430 = vmatprep.subr.bf16.mxu0 %v2682_v44  ;;  %v2722_v36 = vld [vmem:[%s3205_s6 + $0x200] sm:$0xff]   ;;  %v2729_v43 = vld [vmem:[%s3205_s6 + $0x238] sm:$0xff]  }
 0x119   : > { %2485 = vmatpush3.bf16.msra.mxu1 %v2681_v41  ;;  %v3038_v60 = vsel %vm1648_vm8, %v1654_v51, %v1663_v58  ;;  %v2726_v40 = vld [vmem:[%s3205_s6 + $0x220] sm:$0xff]   ;;  %v2727_v41 = vld [vmem:[%s3205_s6 + $0x228] sm:$0xff]  }
 0x11a   : > { %2486 = vmatprep.subr.bf16.mxu1 %v2683_v33  ;;  %v2010_v48 = vld [vmem:[%s3204_s5] ss:$0 sm:$0xff] }
 0x11b   : > { %2431 = vmatpush3.bf16.msra.mxu0 %v2682_v44  ;;  %v2022_v49 = vld [vmem:[%s3206_s7] ss:$0 sm:$0xff] }
 0x11c   : > { %2432 = vmatprep.subr.bf16.mxu0 %v2684_v59  ;;  %v2583_v44 = vadd.f32 %v2022_v49, %v2010_v48 }
 0x11d   : > { %2487 = vmatpush3.bf16.msra.mxu1 %v2683_v33 }
 0x11e   : > { %2488 = vmatprep.subr.bf16.mxu1 %v2685_v61 }
 0x11f   : > { %2433 = vmatpush3.bf16.msra.mxu0 %v2684_v59 }
 0x120   : > { %2434 = vmatprep.subr.bf16.mxu0 %v2686_v62 }
 0x121   : > { %2489 = vmatpush3.bf16.msra.mxu1 %v2685_v61 }
 0x122   : > { %2490 = vmatprep.subr.bf16.mxu1 %v2687_v63 }
 0x123   : > { %2435 = vmatpush3.bf16.msra.mxu0 %v2686_v62 }
 0x124   : > { %2440 = vmatprep.subr.bf16.mxu0 %v2688_v0 }
 0x125   : > { %2491 = vmatpush3.bf16.msra.mxu1 %v2687_v63 }
 0x126   : > { %2437 = vmatmul.mubr.bf16.vlgmr.msra.gmra.mrb[8].mxu0 %v885_v37  ;;  %2492 = vmatprep.subr.bf16.mxu1 %v2689_v1  ;;  %v2723_v37 = vld [vmem:[%s3205_s6 + $0x208] sm:$0xff]  }
 0x127   : > { %2441 = vmatpush3.bf16.msra.mxu0 %v2688_v0  ;;  %2456 = vmatprep.mubr.bf16.mxu0 %v2978_v21  ;;  %v2708_v21 = vld [vmem:[%s3205_s6 + $0x190] sm:$0xff]  }
 0x128   : > { %2442 = vmatprep.subr.bf16.mxu0 %v2690_v2 }
 0x129   : > { %2493 = vmatpush3.bf16.msra.mxu1 %v2689_v1 }
 0x12a   : > { %2494 = vmatprep.subr.bf16.mxu1 %v2691_v3 }
 0x12b   : > { %2443 = vmatpush3.bf16.msra.mxu0 %v2690_v2 }
 0x12c   : > { %2444 = vmatprep.subr.bf16.mxu0 %v2692_v4 }
 0x12d   : > { %2495 = vmatpush3.bf16.msra.mxu1 %v2691_v3 }
 0x12e   : > { %2500 = vmatprep.subr.bf16.mxu1 %v2693_v5 }
 0x12f   : > { %2445 = vmatpush3.bf16.msra.mxu0 %v2692_v4 }
 0x130   : > { %2497 = vmatmul.mubr.bf16.vlgmr.msra.gmra.mrb[0].mxu1 %v1274_v50  ;;  %2446 = vmatprep.subr.bf16.mxu0 %v2694_v6 }
 0x131   : > { %2501 = vmatpush3.bf16.msra.mxu1 %v2693_v5  ;;  %2516 = vmatprep.mubr.bf16.mxu1 %v2985_v24  ;;  %v2711_v24 = vld [vmem:[%s3205_s6 + $0x1a8] sm:$0xff]  }
 0x132   : > { %2502 = vmatprep.subr.bf16.mxu1 %v2695_v7 }
 0x133   : > { %2447 = vmatpush3.bf16.msra.mxu0 %v2694_v6 }
 0x134   : > { %2448 = vmatprep.subr.bf16.mxu0 %v2696_v9 }
 0x135   : > { %2503 = vmatpush3.bf16.msra.mxu1 %v2695_v7 }
 0x136   : > { %2504 = vmatprep.subr.bf16.mxu1 %v2697_v10 }
 0x137   : > { %2449 = vmatpush3.bf16.msra.mxu0 %v2696_v9 }
 0x138   : > { %2450 = vmatprep.subr.bf16.mxu0 %v2698_v11 }
 0x139   : > { %2505 = vmatpush3.bf16.msra.mxu1 %v2697_v10 }
 0x13a   : > { %2506 = vmatprep.subr.bf16.mxu1 %v2699_v12 }
 0x13b   : > { %2451 = vmatpush3.bf16.msra.mxu0 %v2698_v11 }
 0x13c   : > { %2452 = vmatprep.subr.bf16.mxu0 %v2700_v13 }
 0x13d   : > { %2507 = vmatpush3.bf16.msra.mxu1 %v2699_v12 }
 0x13e   : > { %2508 = vmatprep.subr.bf16.mxu1 %v2701_v14 }
 0x13f   : > { %2453 = vmatpush3.bf16.msra.mxu0 %v2700_v13 }
 0x140   : > { %2454 = vmatprep.subr.bf16.mxu0 %v2702_v15 }
 0x141   : > { %2509 = vmatpush3.bf16.msra.mxu1 %v2701_v14 }
 0x142   : > { %2510 = vmatprep.subr.bf16.mxu1 %v2703_v16 }
 0x143   : > { %2455 = vmatpush3.bf16.msra.mxu0 %v2702_v15 }
 0x145   : > { %2511 = vmatpush3.bf16.msra.mxu1 %v2703_v16 }
 0x146   : > { %2457 = vmatmul.mubr.bf16.vlgmr.msra.gmra.mrb[8].mxu0 %v2995_v34  ;;  %2512 = vmatprep.subr.bf16.mxu1 %v2704_v17  ;;  %v2720_v34 = vld [vmem:[%s3205_s6 + $0x1f0] sm:$0xff]  }
 0x149   : > { %2513 = vmatpush3.bf16.msra.mxu1 %v2704_v17 }
 0x14a   : > { %2514 = vmatprep.subr.bf16.mxu1 %v2705_v18 }
 0x14d   : > { %2515 = vmatpush3.bf16.msra.mxu1 %v2705_v18 }
 0x14e   : > { %2520 = vmatprep.subr.bf16.mxu1 %v2706_v19 }
 0x150   : > { %2517 = vmatmul.mubr.bf16.vlgmr.msra.gmra.mrb[0].mxu1 %v2998_v35  ;;  %v2721_v35 = vld [vmem:[%s3205_s6 + $0x1f8] sm:$0xff]  }
 0x151   : > { %2521 = vmatpush3.bf16.msra.mxu1 %v2706_v19  ;;  %2536 = vmatprep.mubr.bf16.mxu1 %v3004_v38  ;;  %v2724_v38 = vld [vmem:[%s3205_s6 + $0x210] sm:$0xff]  }
 0x152   : > { %2522 = vmatprep.subr.bf16.mxu1 %v2707_v20 }
 0x155   : > { %2523 = vmatpush3.bf16.msra.mxu1 %v2707_v20 }
 0x156   : > { %2524 = vmatprep.subr.bf16.mxu1 %v2708_v21 }
 0x159   : > { %2525 = vmatpush3.bf16.msra.mxu1 %v2708_v21 }
 0x15a   : > { %2526 = vmatprep.subr.bf16.mxu1 %v2709_v22 }
 0x15d   : > { %2527 = vmatpush3.bf16.msra.mxu1 %v2709_v22 }
 0x15e   : > { %2528 = vmatprep.subr.bf16.mxu1 %v2710_v23 }
 0x161   : > { %2529 = vmatpush3.bf16.msra.mxu1 %v2710_v23 }
 0x162   : > { %2530 = vmatprep.subr.bf16.mxu1 %v2711_v24 }
 0x165   : > { %2531 = vmatpush3.bf16.msra.mxu1 %v2711_v24 }
 0x166   : > { %2532 = vmatprep.subr.bf16.mxu1 %v2712_v25 }
 0x169   : > { %2533 = vmatpush3.bf16.msra.mxu1 %v2712_v25 }
 0x16a   : > { %2534 = vmatprep.subr.bf16.mxu1 %v2713_v26 }
 0x16d   : > { %2535 = vmatpush3.bf16.msra.mxu1 %v2713_v26 }
 0x16e   : > { %2540 = vmatprep.subr.bf16.mxu1 %v2714_v27 }
 0x170   : > { %2537 = vmatmul.mubr.bf16.vlgmr.msra.gmra.mrb[0].mxu1 %v3007_v39  ;;  %v2725_v39 = vld [vmem:[%s3205_s6 + $0x218] sm:$0xff]  }
 0x171   : > { %2541 = vmatpush3.bf16.msra.mxu1 %v2714_v27  ;;  %2556 = vmatprep.mubr.bf16.mxu1 %v3029_v56 }
 0x172   : > { %2542 = vmatprep.subr.bf16.mxu1 %v2715_v28 }
 0x175   : > { %2543 = vmatpush3.bf16.msra.mxu1 %v2715_v28 }
 0x176   : > { %2544 = vmatprep.subr.bf16.mxu1 %v2716_v29 }
 0x179   : > { %2545 = vmatpush3.bf16.msra.mxu1 %v2716_v29 }
 0x17a   : > { %2546 = vmatprep.subr.bf16.mxu1 %v2717_v30 }
 0x17d   : > { %2547 = vmatpush3.bf16.msra.mxu1 %v2717_v30 }
 0x17e   : > { %2548 = vmatprep.subr.bf16.mxu1 %v2718_v31 }
 0x181   : > { %2549 = vmatpush3.bf16.msra.mxu1 %v2718_v31 }
 0x182   : > { %2550 = vmatprep.subr.bf16.mxu1 %v2719_v32 }
 0x185   : > { %2551 = vmatpush3.bf16.msra.mxu1 %v2719_v32 }
 0x186   : > { %2552 = vmatprep.subr.bf16.mxu1 %v2720_v34 }
 0x189   : > { %2553 = vmatpush3.bf16.msra.mxu1 %v2720_v34 }
 0x18a   : > { %2554 = vmatprep.subr.bf16.mxu1 %v2721_v35 }
 0x18d   : > { %2555 = vmatpush3.bf16.msra.mxu1 %v2721_v35 }
 0x18e   : > { %2560 = vmatprep.subr.bf16.mxu1 %v2722_v36 }
 0x190   : > { %2557 = vmatmul.mubr.bf16.vlgmr.msra.gmra.mrb[0].mxu1 %v3038_v60 }
 0x191   : > { %2561 = vmatpush3.bf16.msra.mxu1 %v2722_v36  ;;  %2576 = vmatprep.mubr.bf16.mxu1 %v3023_v55 }
 0x192   : > { %2562 = vmatprep.subr.bf16.mxu1 %v2723_v37 }
 0x195   : > { %2563 = vmatpush3.bf16.msra.mxu1 %v2723_v37 }
 0x196   : > { %2564 = vmatprep.subr.bf16.mxu1 %v2724_v38 }
 0x199   : > { %2565 = vmatpush3.bf16.msra.mxu1 %v2724_v38 }
 0x19a   : > { %2566 = vmatprep.subr.bf16.mxu1 %v2725_v39 }
 0x19d   : > { %2567 = vmatpush3.bf16.msra.mxu1 %v2725_v39 }
 0x19e   : > { %2568 = vmatprep.subr.bf16.mxu1 %v2726_v40 }
 0x1a1   : > { %2569 = vmatpush3.bf16.msra.mxu1 %v2726_v40 }
 0x1a2   : > { %2570 = vmatprep.subr.bf16.mxu1 %v2727_v41 }
 0x1a5   : > { %2571 = vmatpush3.bf16.msra.mxu1 %v2727_v41 }
 0x1a6   : > { %2572 = vmatprep.subr.bf16.mxu1 %v2728_v42 }
 0x1a9   : > { %2573 = vmatpush3.bf16.msra.mxu1 %v2728_v42 }
 0x1aa   : > { %2574 = vmatprep.subr.bf16.mxu1 %v2729_v43 }
 0x1ad   : > { %2575 = vmatpush3.bf16.msra.mxu1 %v2729_v43 }
 0x1b0   : > { %2577 = vmatmul.mubr.bf16.vlgmr.msra.gmra.mrb[0].mxu1 %v3032_v57 }
 0x219   : > { %v2458_v45 = vpop.f32.mrb[8].mxu0 }
 0x21a   : > { %v1099_v8 = vpop.f32.mrb[9].mxu0  ;;  %v2581_v50 = vadd.f32 %v2583_v44, %v2458_v45 }
 0x21b   : > { %v2459_v46 = vpop.f32.mrb[10].mxu0  ;;  %v2584_v51 = vadd.f32 %v2583_v44, %v1099_v8 }
 0x21c   : > { %v1102_v47 = vpop.f32.mrb[11].mxu0  ;;  %v2587_v53 = vadd.f32 %v2583_v44, %v2459_v46 }
 0x21d   : > { %v2590_v33 = vadd.f32 %v2583_v44, %v1102_v47 }
 0x283   : > { %v2578_v52 = vpop.f32.mrb[0].mxu1 }
 0x284   : > { %v2582_v54 = vadd.f32 %v2581_v50, %v2578_v52  ;;  %v1875_v55 = vpop.f32.mrb[1].mxu1 }
 0x285   : > { %v2585_v56 = vadd.f32 %v2584_v51, %v1875_v55  ;;  %v2579_v57 = vpop.f32.mrb[2].mxu1 }
 0x286   : > { %v2588_v58 = vadd.f32 %v2587_v53, %v2579_v57  ;;  %v1878_v59 = vpop.f32.mrb[3].mxu1  ;;  %v1896_v61 = vmax.f32 %v2582_v54, 0.0 }
 0x287   : > { %v2591_v60 = vadd.f32 %v2590_v33, %v1878_v59  ;;  %v1894_v63 = vmax.f32 %v2585_v56, 0.0 }
 0x288   : > { %v1897_v62 = vmax.f32 %v2588_v58, 0.0 }
 0x289   : > { %v1895_v0 = vmax.f32 %v2591_v60, 0.0 }
 0x28a   : > { %v2241_v1 = vpack.c.bf16 %v1897_v62, %v1896_v61 }
 0x28b   : > { %v2236_v2 = vpack.c.bf16 %v1895_v0, %v1894_v63 }
 0x28c   : > { %2243 = vst [vmem:[%s329_s22 + $0x8] sm:$0xff] %v2241_v1  }
 0x28d   : > { %2237 = vst [vmem:[%s329_s22] sm:$0xff] %v2236_v2  }
 0x28e PF: > { %s18_s27 = sadd.s32 1, %s2736_s27  }
 0x28f   : > { %p15_p5 = scmp.ge.s32.totalorder %s18_s27, 10  }
 0x291   :  { %17 = sbr.rel (!%p15_p5) target bundleno = 1 (0x1), region = 93 }

// kernel: model_forward.3
= control target key start
LH: loop header
LB: loop body
LE: loop exit
PB: predicated region body
PF: predicated region fallthrough
CT: control target
= control target key end

     0   :  { %s2749_s27 = smov 0   ;;  %s3164_s0 = inlined_call_operand.vmem [shape: bf16[512,128], index: 0, kind: input, shape index: {}]   ;;  %s3165_s1 = inlined_call_operand.vmem [shape: f32[512,1], index: 1, kind: input, shape index: {}]   ;;  %s3166_s2 = inlined_call_operand.vmem [shape: bf16[128,128], index: 2, kind: input, shape index: {}]   ;;  %s3167_s3 = inlined_call_operand.vmem [shape: f32[1,128], index: 3, kind: input, shape index: {}]   ;;  %s3168_s4 = inlined_call_operand.vmem [shape: bf16[128,128], index: 4, kind: input, shape index: {}]   ;;  %s3169_s5 = inlined_call_operand.vmem [shape: f32[1,128], index: 5, kind: input, shape index: {}]   ;;  %s3170_s6 = inlined_call_operand.vmem [shape: bf16[9,128,128], index: 6, kind: input, shape index: {}]   ;;  %s3171_s7 = inlined_call_operand.vmem [shape: f32[1,128], index: 7, kind: input, shape index: {}]   ;;  %s3172_s8 = inlined_call_operand.vmem [shape: f32[256,128], index: 8, kind: output, shape index: {}]  }
   0x1 LB: > { %s1970_s28 = sadd.s32 4294967295, %s2701_s27   ;;  %p1974_p0 = scmp.ge.s32.totalorder %s2701_s27, 1  ;;  %s2701_s27 = sphi %s2749_s27, %s18_s27  }
   0x2   : > { %p274_p1 = scmp.lt.s32.totalorder %s2701_s27, 9 }
   0x4   : > { %p275_p2 = pnand %p1974_p0, %p274_p1 }
   0x5   : > { %v2600_v0 = vld [vmem:[%s3166_s2] sm:$0xff] (!%p275_p2)   ;;  %s1975_s9 = sshll.u32 (!%p275_p2), %s1970_s28, 3  ;;  %v2601_v1 = vld [vmem:[%s3166_s2 + $0x8] sm:$0xff] (!%p275_p2)   ;;  %v2703_v2 = vmov (!%p275_p2), 0   ;;  %v2602_v3 = vld [vmem:[%s3166_s2 + $0x10] sm:$0xff] (!%p275_p2)   ;;  %vm1135_vm1 = vcmask (!%p275_p2), 1042432  }
   0x6   : > { %278 = sbr.rel (%p275_p2) target bundleno = 652 (0x28c), region = 52  ;;  %p314_p3 = scmp.lt.s32.totalorder (!%p275_p2), %s1975_s9, 63  ;;  %2321 = vmatprep.subr.bf16.mxu0 (!%p275_p2), %v2600_v0  ;;  %2599 = vset.pattern.permute.xlu1 (!%p275_p2), %v2703_v2  ;;  %v2603_v4 = vld [vmem:[%s3166_s2 + $0x18] sm:$0xff] (!%p275_p2)   ;;  %v2604_v10 = vld [vmem:[%s3166_s2 + $0x20] sm:$0xff] (!%p275_p2)   ;;  %v2605_v12 = vld [vmem:[%s3166_s2 + $0x28] sm:$0xff] (!%p275_p2)   ;;  %vm1009_vm3 = vcmask (!%p275_p2), 1046528  }
   0x7   : > { %2322 = vmatpush3.bf16.msra.mxu0 (!%p275_p2), %v2600_v0  ;;  %2598 = vset.pattern.permute.xlu0 (!%p275_p2), %v2703_v2  ;;  %v2606_v22 = vld [vmem:[%s3166_s2 + $0x30] sm:$0xff] (!%p275_p2)   ;;  %v2607_v27 = vld [vmem:[%s3166_s2 + $0x38] sm:$0xff] (!%p275_p2)   ;;  %v2626_v36 = vld [vmem:[%s3170_s6 + $0xc0] sm:$0xff] (!%p275_p2)   ;;  %vm594_vm0 = vsmask.f32 (!%p275_p2), 6400  ;;  %vm1395_vm5 = vcmask (!%p275_p2), 1041408  }
   0x8   : > { %2323 = vmatprep.subr.bf16.mxu0 (!%p275_p2), %v2601_v1  ;;  %v2615_v38 = vld [vmem:[%s3168_s4] sm:$0xff] (!%p275_p2)   ;;  %2425 = vmatprep.subr.bf16.mxu1 (!%p275_p2), %v2626_v36  ;;  %v2628_v40 = vld [vmem:[%s3170_s6 + $0xc8] sm:$0xff] (!%p275_p2)   ;;  %v2630_v44 = vld [vmem:[%s3170_s6 + $0xd0] sm:$0xff] (!%p275_p2)   ;;  %vm865_vm2 = vsmask.f32 (!%p275_p2), 7424  ;;  %vm1522_vm6 = vcmask (!%p275_p2), 1045504  }
   0x9   : > { %2426 = vmatpush3.bf16.msra.mxu1 (!%p275_p2), %v2626_v36  ;;  %v2616_v42 = vld [vmem:[%s3168_s4 + $0x8] sm:$0xff] (!%p275_p2)   ;;  %v2617_v46 = vld [vmem:[%s3168_s4 + $0x10] sm:$0xff] (!%p275_p2)   ;;  %v2618_v50 = vld [vmem:[%s3168_s4 + $0x18] sm:$0xff] (!%p275_p2)   ;;  %vm1261_vm4 = vsmask.f32 (!%p275_p2), 2304  ;;  %vm1785_vm7 = vcmask (!%p275_p2), 1044480  }
   0xa   : > { %2427 = vmatprep.subr.bf16.mxu1 (!%p275_p2), %v2628_v40  ;;  %v2619_v52 = vld [vmem:[%s3168_s4 + $0x20] sm:$0xff] (!%p275_p2)   ;;  %v2620_v53 = vld [vmem:[%s3168_s4 + $0x28] sm:$0xff] (!%p275_p2)   ;;  %v2621_v54 = vld [vmem:[%s3168_s4 + $0x30] sm:$0xff] (!%p275_p2)   ;;  %vm1648_vm8 = vsmask.f32 (!%p275_p2), 5376 }
   0xb   : > { %2324 = vmatpush3.bf16.msra.mxu0 (!%p275_p2), %v2601_v1  ;;  %v2622_v55 = vld [vmem:[%s3168_s4 + $0x38] sm:$0xff] (!%p275_p2)   ;;  %v2623_v56 = vld [vmem:[%s3170_s6] sm:$0xff] (!%p275_p2)   ;;  %v2624_v58 = vld [vmem:[%s3170_s6 + $0x8] sm:$0xff] (!%p275_p2)  }
   0xc   : > { %2325 = vmatprep.subr.bf16.mxu0 (!%p275_p2), %v2602_v3  ;;  %v2625_v60 = vld [vmem:[%s3170_s6 + $0x10] sm:$0xff] (!%p275_p2)   ;;  %v2627_v61 = vld [vmem:[%s3170_s6 + $0x18] sm:$0xff] (!%p275_p2)   ;;  %v2629_v62 = vld [vmem:[%s3170_s6 + $0x20] sm:$0xff] (!%p275_p2)  }
   0xd   : > { %s3174_s9 = smov (!%p314_p3, %s1975_s9), 63  ;;  %2428 = vmatpush3.bf16.msra.mxu1 %v2628_v40  ;;  %v2631_v63 = vld [vmem:[%s3170_s6 + $0x28] sm:$0xff]   ;;  %v2632_v0 = vld [vmem:[%s3170_s6 + $0xd8] sm:$0xff]   ;;  %v2633_v1 = vld [vmem:[%s3170_s6 + $0x30] sm:$0xff]  }
   0xe   : > { %s1976_s14 = sshll.u32 %s3174_s9, 2  ;;  %s1978_s18 = sshll.u32 %s3174_s9, 3  ;;  %2429 = vmatprep.subr.bf16.mxu1 %v2630_v44  ;;  %v2634_v2 = vld [vmem:[%s3170_s6 + $0xe0] sm:$0xff]  }
   0xf   : > { %s2771_s17 = scalar_lea.vmem %s3164_s0, %s1976_s14  ;;  %s2781_s23 = scalar_lea.vmem %s3165_s1, %s1978_s18  ;;  %2326 = vmatpush3.bf16.msra.mxu0 %v2602_v3  ;;  %v2635_v3 = vld [vmem:[%s3170_s6 + $0x38] sm:$0xff]  }
  0x10   : > { %v332_v5 = vld [vmem:[%s2771_s17] sm:$0xf]  ;;  %v333_v6 = vld [vmem:[%s2771_s17 + $0x4] sm:$0xf]  ;;  %v510_v8 = vld [vmem:[%s2781_s23 + $0x10] sm:$0xff]  ;;  %2327 = vmatprep.subr.bf16.mxu0 %v2603_v4  ;;  %s1979_s14 = sshll.u32 %s1970_s28, 2 }
  0x11   : > { %v1982_v7 = vcombine.low %v332_v5, %v333_v6  ;;  %v508_v9 = vld [vmem:[%s2781_s23] sm:$0xff]  ;;  %528 = vperm.xlu1 %2599, %v510_v8   ;;  %v511_v11 = vld [vmem:[%s2781_s23 + $0x18] sm:$0xff]  ;;  %v509_v13 = vld [vmem:[%s2781_s23 + $0x8] sm:$0xff]  ;;  %2430 = vmatpush3.bf16.msra.mxu1 %v2630_v44  ;;  %p326_p4 = scmp.lt.s32.totalorder %s1979_s14, 31 }
  0x12   : > { %518 = vperm.xlu0 %2598, %v508_v9   ;;  %v334_v14 = vld [vmem:[%s2771_s17 + $0x8] sm:$0xf]  ;;  %v337_v16 = vld [vmem:[%s2771_s17 + $0x14] sm:$0xf]  ;;  %v335_v17 = vld [vmem:[%s2771_s17 + $0xc] sm:$0xf]  ;;  %2431 = vmatprep.subr.bf16.mxu1 %v2632_v0 }
  0x13   : > { %2337 = vmatprep.mubr.bf16.mxu0 %v1982_v7  ;;  %2328 = vmatpush3.bf16.msra.mxu0 %v2603_v4  ;;  %v1995_v15 = vcombine.low %v333_v6, %v334_v14  ;;  %v513_v18 = vld [vmem:[%s2781_s23 + $0x28] sm:$0xff]  ;;  %v1997_v19 = vcombine.low %v337_v16, %v337_v16  ;;  %v512_v20 = vld [vmem:[%s2781_s23 + $0x20] sm:$0xff]  ;;  %v336_v21 = vld [vmem:[%s2771_s17 + $0x10] sm:$0xf]  ;;  %v1983_v41 = vcombine.low %v334_v14, %v335_v17  ;;  %s3176_s14 = smov (!%p326_p4, %s1979_s14), 31 }
  0x14   : > { %2329 = vmatprep.subr.bf16.mxu0 %v2604_v10  ;;  %v1996_v24 = vcombine.low %v335_v17, %v336_v21  ;;  %v515_v26 = vld [vmem:[%s2781_s23 + $0x38] sm:$0xff]  ;;  %v514_v30 = vld [vmem:[%s2781_s23 + $0x30] sm:$0xff]  ;;  %v1984_v45 = vcombine.low %v336_v21, %v337_v16  ;;  %v2636_v4 = vld [vmem:[%s3170_s6 + $0xe8] sm:$0xff]   ;;  %s1980_s20 = sshll.u32 %s3176_s14, 3 }
  0x15   : > { %533 = vperm.xlu1 %2599, %v511_v11   ;;  %v596_v23 = vshrl.u32 %v1995_v15, 16  ;;  %v599_v25 = vshll.u32 %v1995_v15, 16  ;;  %v613_v28 = vshrl.u32 %v1997_v19, 16  ;;  %v616_v29 = vshll.u32 %v1997_v19, 16  ;;  %v2614_v47 = vld [vmem:[%s2771_s17 + $0x18] sm:$0xff]   ;;  %2432 = vmatpush3.bf16.msra.mxu1 %v2632_v0  ;;  %v2879_v5 = vld [vmem:[%s3170_s6 + $0x40] sm:$0xff]   ;;  %s329_s22 = scalar_lea.vmem %s3172_s8, %s1980_s20 }
  0x16   : > { %523 = vperm.xlu0 %2598, %v509_v13   ;;  %v604_v31 = vshrl.u32 %v1996_v24, 16  ;;  %v607_v32 = vshll.u32 %v1996_v24, 16  ;;  %2433 = vmatprep.subr.bf16.mxu1 %v2634_v2  ;;  %v2638_v6 = vld [vmem:[%s3170_s6 + $0xf0] sm:$0xff]   ;;  %v2640_v7 = vld [vmem:[%s3170_s6 + $0xf8] sm:$0xff]   ;;  %v2891_v8 = vld [vmem:[%s3170_s6 + $0x100] sm:$0xff]  }
  0x17   : > { %2330 = vmatpush3.bf16.msra.mxu0 %v2604_v10  ;;  %v598_v33 = vrot.slane %v596_v23, 1  ;;  %v601_v34 = vrot.slane %v599_v25, 2  ;;  %v615_v35 = vrot.slane %v613_v28, 1  ;;  %v618_v37 = vrot.slane %v616_v29, 2  ;;  %v1981_v11 = vld [vmem:[%s3167_s3] ss:$0 sm:$0xff] }
  0x18   : > { %2331 = vmatprep.subr.bf16.mxu0 %v2605_v12  ;;  %v606_v39 = vrot.slane %v604_v31, 1  ;;  %v609_v43 = vrot.slane %v607_v32, 2 }
  0x19   : > { %543 = vperm.xlu1 %2599, %v513_v18   ;;  %v602_v48 = vor.u32 %v601_v34, %v598_v33  ;;  %v619_v57 = vor.u32 %v618_v37, %v615_v35  ;;  %2434 = vmatpush3.bf16.msra.mxu1 %v2634_v2 }
  0x1a   : > { %538 = vperm.xlu0 %2598, %v512_v20   ;;  %v610_v49 = vor.u32 %v609_v43, %v606_v39  ;;  %2435 = vmatprep.subr.bf16.mxu1 %v2636_v4  ;;  %v2639_v43 = vld [vmem:[%s3170_s6 + $0x48] sm:$0xff]  }
  0x1b   : > { %2332 = vmatpush3.bf16.msra.mxu0 %v2605_v12 }
  0x1c   : > { %2333 = vmatprep.subr.bf16.mxu0 %v2606_v22  ;;  %v611_v51 = vsel %vm594_vm0, %v602_v48, %v610_v49  ;;  %v620_v59 = vsel %vm594_vm0, %v610_v49, %v619_v57 }
  0x1d   : > { %553 = vperm.xlu1 %2599, %v515_v26   ;;  %2436 = vmatpush3.bf16.msra.mxu1 %v2636_v4 }
  0x1e   : > { %548 = vperm.xlu0 %2598, %v514_v30   ;;  %2437 = vmatprep.subr.bf16.mxu1 %v2638_v6 }
  0x1f   : > { %2334 = vmatpush3.bf16.msra.mxu0 %v2606_v22 }
  0x20   : > { %2335 = vmatprep.subr.bf16.mxu0 %v2607_v27 }
  0x21   : > { %2438 = vmatpush3.bf16.msra.mxu1 %v2638_v6 }
  0x22   : > { %2439 = vmatprep.subr.bf16.mxu1 %v2640_v7 }
  0x23   : > { %2336 = vmatpush3.bf16.msra.mxu0 %v2607_v27 }
  0x24   : > { %2345 = vmatprep.subr.bf16.mxu0 %v2615_v38 }
  0x25   : > { %2440 = vmatpush3.bf16.msra.mxu1 %v2640_v7 }
  0x26   : > { %2338 = vmatmul.mubr.bf16.vlgmr.msra.gmra.mrb[0].mxu0 %v1983_v41  ;;  %2445 = vmatprep.subr.bf16.mxu1 %v2891_v8 }
  0x27   : > { %2341 = vmatprep.mubr.bf16.mxu0 %v1984_v45  ;;  %2346 = vmatpush3.bf16.msra.mxu0 %v2615_v38 }
  0x28   : > { %2347 = vmatprep.subr.bf16.mxu0 %v2616_v42 }
  0x2b   : > { %2348 = vmatpush3.bf16.msra.mxu0 %v2616_v42 }
  0x2c   : > { %2349 = vmatprep.subr.bf16.mxu0 %v2617_v46 }
  0x2e   : > { %2342 = vmatmul.mubr.bf16.gmra.mrb[4].mxu0 %v2614_v47 }
  0x2f   : > { %2350 = vmatpush3.bf16.msra.mxu0 %v2617_v46  ;;  %2361 = vmatprep.mubr.bf16.mxu0 %v611_v51 }
  0x30   : > { %2351 = vmatprep.subr.bf16.mxu0 %v2618_v50 }
  0x33   : > { %2352 = vmatpush3.bf16.msra.mxu0 %v2618_v50 }
  0x34   : > { %2353 = vmatprep.subr.bf16.mxu0 %v2619_v52 }
  0x37   : > { %2354 = vmatpush3.bf16.msra.mxu0 %v2619_v52 }
  0x38   : > { %2355 = vmatprep.subr.bf16.mxu0 %v2620_v53 }
  0x3b   : > { %2356 = vmatpush3.bf16.msra.mxu0 %v2620_v53 }
  0x3c   : > { %2357 = vmatprep.subr.bf16.mxu0 %v2621_v54 }
  0x3f   : > { %2358 = vmatpush3.bf16.msra.mxu0 %v2621_v54 }
  0x40   : > { %2359 = vmatprep.subr.bf16.mxu0 %v2622_v55 }
  0x43   : > { %2360 = vmatpush3.bf16.msra.mxu0 %v2622_v55 }
  0x44   : > { %2365 = vmatprep.subr.bf16.mxu0 %v2623_v56 }
  0x46   : > { %2362 = vmatmul.mubr.bf16.vlgmr.msra.gmra.mrb[8].mxu0 %v620_v59 }
  0x47   : > { %2366 = vmatpush3.bf16.msra.mxu0 %v2623_v56 }
  0x48   : > { %2367 = vmatprep.subr.bf16.mxu0 %v2624_v58 }
  0x4b   : > { %2368 = vmatpush3.bf16.msra.mxu0 %v2624_v58 }
  0x4c   : > { %2369 = vmatprep.subr.bf16.mxu0 %v2625_v60 }
  0x4f   : > { %2370 = vmatpush3.bf16.msra.mxu0 %v2625_v60 }
  0x50   : > { %2371 = vmatprep.subr.bf16.mxu0 %v2627_v61 }
  0x53   : > { %2372 = vmatpush3.bf16.msra.mxu0 %v2627_v61  ;;  %v2641_v61 = vld [vmem:[%s3170_s6 + $0x50] sm:$0xff]  }
  0x54   : > { %2373 = vmatprep.subr.bf16.mxu0 %v2629_v62 }
  0x57   : > { %2374 = vmatpush3.bf16.msra.mxu0 %v2629_v62 }
  0x58   : > { %2375 = vmatprep.subr.bf16.mxu0 %v2631_v63 }
  0x5b   : > { %2376 = vmatpush3.bf16.msra.mxu0 %v2631_v63 }
  0x5c   : > { %2377 = vmatprep.subr.bf16.mxu0 %v2633_v1 }
  0x5f   : > { %2378 = vmatpush3.bf16.msra.mxu0 %v2633_v1 }
  0x60   : > { %2379 = vmatprep.subr.bf16.mxu0 %v2635_v3 }
  0x63   : > { %2380 = vmatpush3.bf16.msra.mxu0 %v2635_v3 }
  0x64   : > { %2385 = vmatprep.subr.bf16.mxu0 %v2879_v5 }
  0x90   : > { %v529_v10 = vpop.permute.xlu1 %528 }
  0x91   : > { %v519_v9 = vpop.permute.xlu0 %518 }
  0x94   : > { %v534_v16 = vpop.permute.xlu1 %533 }
  0x95   : > { %v524_v12 = vpop.permute.xlu0 %523 }
  0x98   : > { %v544_v30 = vpop.permute.xlu1 %543 }
  0x99   : > { %v539_v25 = vpop.permute.xlu0 %538 }
  0x9c   : > { %v554_v54 = vpop.permute.xlu1 %553 }
  0x9d   : > { %v549_v45 = vpop.permute.xlu0 %548 }
  0xf9   : > { %v2339_v13 = vpop.f32.mrb[0].mxu0 }
  0xfa   : > { %v478_v14 = vadd.f32 %v2339_v13, %v1981_v11  ;;  %v469_v15 = vpop.f32.mrb[1].mxu0 }
  0xfb   : > { %v470_v17 = vadd.f32 %v1981_v11, %v469_v15  ;;  %v2340_v18 = vpop.f32.mrb[2].mxu0 }
  0xfc   : > { %v502_v19 = vmax.f32 %v478_v14, 0.0  ;;  %v481_v20 = vadd.f32 %v2340_v18, %v1981_v11  ;;  %v472_v21 = vpop.f32.mrb[3].mxu0  ;;  %v2643_v14 = vld [vmem:[%s3170_s6 + $0x58] sm:$0xff]  }
  0xfd   : > { %v500_v22 = vmax.f32 %v470_v17, 0.0  ;;  %v473_v23 = vadd.f32 %v1981_v11, %v472_v21 }
  0xfe   : > { %v503_v24 = vmax.f32 %v481_v20, 0.0  ;;  %v558_v27 = vmul.f32 %v529_v10, %v502_v19 }
  0xff   : > { %v501_v26 = vmax.f32 %v473_v23, 0.0  ;;  %v556_v29 = vmul.f32 %v519_v9, %v500_v22  ;;  %v2644_v22 = vld [vmem:[%s3170_s6 + $0x108] sm:$0xff]  }
 0x100   : > { %v559_v28 = vmul.f32 %v534_v16, %v503_v24 }
 0x101   : > { %v557_v31 = vmul.f32 %v524_v12, %v501_v26  ;;  %v2343_v32 = vpop.f32.mrb[4].mxu0 }
 0x102   : > { %v2897_v33 = vpack.c.bf16 %v559_v28, %v558_v27  ;;  %v494_v34 = vadd.f32 %v2343_v32, %v1981_v11  ;;  %v485_v35 = vpop.f32.mrb[5].mxu0 }
 0x103   : > { %v2899_v36 = vpack.c.bf16 %v557_v31, %v556_v29  ;;  %v486_v37 = vadd.f32 %v1981_v11, %v485_v35  ;;  %v2344_v38 = vpop.f32.mrb[6].mxu0  ;;  %v2645_v31 = vld [vmem:[%s3170_s6 + $0x60] sm:$0xff]  }
 0x104   : > { %v506_v39 = vmax.f32 %v494_v34, 0.0  ;;  %v497_v40 = vadd.f32 %v2344_v38, %v1981_v11  ;;  %v488_v41 = vpop.f32.mrb[7].mxu0  ;;  %v1137_v42 = vrot.slane %v2897_v33, 5  ;;  %v2906_v44 = vshll.u32 %v2897_v33, 16 }
 0x105   : > { %v504_v46 = vmax.f32 %v486_v37, 0.0  ;;  %v489_v47 = vadd.f32 %v1981_v11, %v488_v41  ;;  %2381 = vmatprep.mubr.bf16.mxu0 %v2899_v36  ;;  %v1136_v48 = vrot.slane %v2899_v36, 5  ;;  %v867_v49 = vshrl.u32 %v2899_v36, 16  ;;  %v2646_v41 = vld [vmem:[%s3170_s6 + $0x110] sm:$0xff]  }
 0x106   : > { %v562_v50 = vmul.f32 %v549_v45, %v506_v39  ;;  %v507_v51 = vmax.f32 %v497_v40, 0.0  ;;  %2382 = vmatmul.mubr.bf16.vlgmr.msra.gmra.mrb[8].mxu0 %v2897_v33  ;;  %v869_v52 = vshll.u32 %v2899_v36, 16  ;;  %v876_v53 = vrot.slane %v2906_v44, 1 }
 0x107   : > { %v560_v55 = vmul.f32 %v539_v25, %v504_v46  ;;  %v505_v56 = vmax.f32 %v489_v47, 0.0  ;;  %2386 = vmatpush3.bf16.msra.mxu0 %v2879_v5  ;;  %v1138_v57 = vsel %vm1135_vm1, %v1136_v48, %v1137_v42  ;;  %v2917_v58 = vshrl.u32 %v2897_v33, 16 }
 0x108   : > { %v563_v59 = vmul.f32 %v554_v54, %v507_v51  ;;  %2441 = vmatprep.mubr.bf16.mxu1 %v1138_v57  ;;  %2387 = vmatprep.subr.bf16.mxu0 %v2639_v43  ;;  %v871_v60 = vrot.slane %v869_v52, 1  ;;  %v1262_v62 = vrot.slane %v867_v49, 5  ;;  %v1263_v63 = vrot.slane %v869_v52, 6 }
 0x109   : > { %v561_v0 = vmul.f32 %v544_v30, %v505_v56  ;;  %v1265_v1 = vrot.slane %v2917_v58, 5  ;;  %v1266_v2 = vrot.slane %v2906_v44, 6  ;;  %v880_v3 = vor.u32 %v2917_v58, %v876_v53 }
 0x10a   : > { %v2925_v4 = vpack.c.bf16 %v563_v59, %v562_v50  ;;  %v872_v5 = vor.u32 %v871_v60, %v867_v49  ;;  %v1264_v6 = vor.u32 %v1263_v63, %v1262_v62  ;;  %v1010_v7 = vrot.slane %v2899_v36, 1  ;;  %v2649_v59 = vld [vmem:[%s3170_s6 + $0x70] sm:$0xff]   ;;  %v2651_v62 = vld [vmem:[%s3170_s6 + $0x78] sm:$0xff]   ;;  %v2652_v63 = vld [vmem:[%s3170_s6 + $0x128] sm:$0xff]  }
 0x10b   : > { %v2928_v9 = vpack.c.bf16 %v561_v0, %v560_v55  ;;  %2388 = vmatpush3.bf16.msra.mxu0 %v2639_v43  ;;  %v1267_v10 = vor.u32 %v1266_v2, %v1265_v1  ;;  %v1011_v11 = vrot.slane %v2897_v33, 1  ;;  %v1396_v12 = vrot.slane %v2899_v36, 6  ;;  %v2653_v0 = vld [vmem:[%s3170_s6 + $0x80] sm:$0xff]   ;;  %v2654_v1 = vld [vmem:[%s3170_s6 + $0x130] sm:$0xff]   ;;  %v2655_v2 = vld [vmem:[%s3170_s6 + $0x88] sm:$0xff]  }
 0x10c   : > { %v877_v13 = vsel %vm865_vm2, %v872_v5, %v876_v53  ;;  %2389 = vmatprep.subr.bf16.mxu0 %v2641_v61  ;;  %v1397_v15 = vrot.slane %v2897_v33, 6  ;;  %v1523_v16 = vrot.slane %v2897_v33, 2  ;;  %v1526_v17 = vrot.slane %v2925_v4, 2  ;;  %v2658_v5 = vld [vmem:[%s3170_s6 + $0x140] sm:$0xff]  }
 0x10d   : > { %2401 = vmatprep.mubr.bf16.mxu0 %v877_v13  ;;  %v1139_v18 = vrot.slane %v2928_v9, 5  ;;  %v1268_v19 = vsel %vm1261_vm4, %v1264_v6, %v1267_v10  ;;  %v882_v20 = vshll.u32 %v2928_v9, 16  ;;  %v2943_v21 = vsel %vm1009_vm3, %v1010_v7, %v1011_v11  ;;  %v2659_v6 = vld [vmem:[%s3170_s6 + $0x98] sm:$0xff]   ;;  %v2660_v7 = vld [vmem:[%s3170_s6 + $0x148] sm:$0xff]   ;;  %v2665_v13 = vld [vmem:[%s3170_s6 + $0xb0] sm:$0xff]  }
 0x10e   : > { %v1269_v23 = vshrl.u32 %v2928_v9, 16  ;;  %v2950_v24 = vsel %vm1395_vm5, %v1396_v12, %v1397_v15  ;;  %v1013_v25 = vrot.slane %v2928_v9, 1  ;;  %v1399_v26 = vrot.slane %v2928_v9, 6  ;;  %v2664_v12 = vld [vmem:[%s3170_s6 + $0x158] sm:$0xff]  }
 0x10f   : > { %2390 = vmatpush3.bf16.msra.mxu0 %v2641_v61  ;;  %v1140_v27 = vsel %vm1135_vm1, %v1137_v42, %v1139_v18  ;;  %v884_v28 = vrot.slane %v882_v20, 1  ;;  %v1272_v29 = vrot.slane %v882_v20, 6  ;;  %v1524_v30 = vrot.slane %v2928_v9, 2  ;;  %v2650_v61 = vld [vmem:[%s3170_s6 + $0x120] sm:$0xff]   ;;  %v2670_v18 = vld [vmem:[%s3170_s6 + $0x178] sm:$0xff]  }
 0x110   : > { %2442 = vmatmul.mubr.bf16.vlgmr.msra.gmra.mrb[0].mxu1 %v1140_v27  ;;  %2391 = vmatprep.subr.bf16.mxu0 %v2643_v14  ;;  %v1271_v32 = vrot.slane %v1269_v23, 5  ;;  %v2960_v34 = vsel %vm1009_vm3, %v1011_v11, %v1013_v25  ;;  %v2963_v35 = vsel %vm1395_vm5, %v1397_v15, %v1399_v26  ;;  %v1649_v36 = vrot.slane %v2917_v58, 2  ;;  %v2663_v11 = vld [vmem:[%s3170_s6 + $0xa8] sm:$0xff]   ;;  %v2667_v15 = vld [vmem:[%s3170_s6 + $0xb8] sm:$0xff]   ;;  %v2677_v25 = vld [vmem:[%s3170_s6 + $0x1b0] sm:$0xff]  }
 0x111   : > { %2446 = vmatpush3.bf16.msra.mxu1 %v2891_v8  ;;  %2461 = vmatprep.mubr.bf16.mxu1 %v1268_v19  ;;  %v885_v37 = vsel %vm865_vm2, %v880_v3, %v884_v28  ;;  %v2969_v38 = vsel %vm1522_vm6, %v1523_v16, %v1524_v30  ;;  %v2972_v39 = vsel %vm1522_vm6, %v1524_v30, %v1526_v17  ;;  %v1650_v40 = vrot.slane %v2906_v44, 3  ;;  %v2647_v44 = vld [vmem:[%s3170_s6 + $0x68] sm:$0xff]   ;;  %v2656_v3 = vld [vmem:[%s3170_s6 + $0x138] sm:$0xff]   ;;  %v2669_v17 = vld [vmem:[%s3170_s6 + $0x170] sm:$0xff]  }
 0x112   : > { %2447 = vmatprep.subr.bf16.mxu1 %v2644_v22  ;;  %v1273_v42 = vor.u32 %v1272_v29, %v1271_v32  ;;  %v1652_v43 = vrot.slane %v1269_v23, 2  ;;  %v1653_v45 = vrot.slane %v882_v20, 3  ;;  %v1657_v8 = vshrl.u32 %v2925_v4, 16  ;;  %v2668_v16 = vld [vmem:[%s3170_s6 + $0x168] sm:$0xff]   ;;  %v2671_v19 = vld [vmem:[%s3170_s6 + $0x180] sm:$0xff]   ;;  %v2678_v26 = vld [vmem:[%s3170_s6 + $0x1b8] sm:$0xff]  }
 0x113   : > { %2392 = vmatpush3.bf16.msra.mxu0 %v2643_v14  ;;  %v1651_v46 = vor.u32 %v1650_v40, %v1649_v36  ;;  %v1660_v47 = vshll.u32 %v2925_v4, 16  ;;  %v1786_v48 = vrot.slane %v2897_v33, 3  ;;  %v1787_v49 = vrot.slane %v2928_v9, 3  ;;  %v2648_v33 = vld [vmem:[%s3170_s6 + $0x118] sm:$0xff]   ;;  %v2661_v9 = vld [vmem:[%s3170_s6 + $0xa0] sm:$0xff]   ;;  %v2672_v20 = vld [vmem:[%s3170_s6 + $0x188] sm:$0xff]  }
 0x114   : > { %2393 = vmatprep.subr.bf16.mxu0 %v2645_v31  ;;  %v1274_v50 = vsel %vm1261_vm4, %v1267_v10, %v1273_v42  ;;  %v1654_v51 = vor.u32 %v1653_v45, %v1652_v43  ;;  %v1659_v52 = vrot.slane %v1657_v8, 2  ;;  %v1789_v53 = vrot.slane %v2925_v4, 3  ;;  %v2657_v4 = vld [vmem:[%s3170_s6 + $0x90] sm:$0xff]   ;;  %v2666_v14 = vld [vmem:[%s3170_s6 + $0x160] sm:$0xff]   ;;  %v2680_v28 = vld [vmem:[%s3170_s6 + $0x1c8] sm:$0xff]  }
 0x115   : > { %2448 = vmatpush3.bf16.msra.mxu1 %v2644_v22  ;;  %v1662_v54 = vrot.slane %v1660_v47, 3  ;;  %v2988_v55 = vsel %vm1785_vm7, %v1786_v48, %v1787_v49  ;;  %v2662_v10 = vld [vmem:[%s3170_s6 + $0x150] sm:$0xff]   ;;  %v2674_v22 = vld [vmem:[%s3170_s6 + $0x198] sm:$0xff]   ;;  %v2675_v23 = vld [vmem:[%s3170_s6 + $0x1a0] sm:$0xff]  }
 0x116   : > { %2449 = vmatprep.subr.bf16.mxu1 %v2646_v41  ;;  %v2994_v56 = vsel %vm1648_vm8, %v1651_v46, %v1654_v51  ;;  %v2997_v57 = vsel %vm1785_vm7, %v1787_v49, %v1789_v53  ;;  %v2679_v27 = vld [vmem:[%s3170_s6 + $0x1c0] sm:$0xff]   ;;  %v2681_v29 = vld [vmem:[%s3170_s6 + $0x1d0] sm:$0xff]   ;;  %v2682_v30 = vld [vmem:[%s3170_s6 + $0x1d8] sm:$0xff]  }
 0x117   : > { %2394 = vmatpush3.bf16.msra.mxu0 %v2645_v31  ;;  %v1663_v58 = vor.u32 %v1662_v54, %v1659_v52  ;;  %v2683_v31 = vld [vmem:[%s3170_s6 + $0x1e0] sm:$0xff]   ;;  %v2684_v32 = vld [vmem:[%s3170_s6 + $0x1e8] sm:$0xff]   ;;  %v2693_v42 = vld [vmem:[%s3170_s6 + $0x230] sm:$0xff]  }
 0x118   : > { %2395 = vmatprep.subr.bf16.mxu0 %v2647_v44  ;;  %v2687_v36 = vld [vmem:[%s3170_s6 + $0x200] sm:$0xff]   ;;  %v2694_v43 = vld [vmem:[%s3170_s6 + $0x238] sm:$0xff]  }
 0x119   : > { %2450 = vmatpush3.bf16.msra.mxu1 %v2646_v41  ;;  %v3003_v60 = vsel %vm1648_vm8, %v1654_v51, %v1663_v58  ;;  %v2691_v40 = vld [vmem:[%s3170_s6 + $0x220] sm:$0xff]   ;;  %v2692_v41 = vld [vmem:[%s3170_s6 + $0x228] sm:$0xff]  }
 0x11a   : > { %2451 = vmatprep.subr.bf16.mxu1 %v2648_v33  ;;  %v1994_v48 = vld [vmem:[%s3169_s5] ss:$0 sm:$0xff] }
 0x11b   : > { %2396 = vmatpush3.bf16.msra.mxu0 %v2647_v44  ;;  %v2006_v49 = vld [vmem:[%s3171_s7] ss:$0 sm:$0xff] }
 0x11c   : > { %2397 = vmatprep.subr.bf16.mxu0 %v2649_v59  ;;  %v2548_v44 = vadd.f32 %v2006_v49, %v1994_v48 }
 0x11d   : > { %2452 = vmatpush3.bf16.msra.mxu1 %v2648_v33 }
 0x11e   : > { %2453 = vmatprep.subr.bf16.mxu1 %v2650_v61 }
 0x11f   : > { %2398 = vmatpush3.bf16.msra.mxu0 %v2649_v59 }
 0x120   : > { %2399 = vmatprep.subr.bf16.mxu0 %v2651_v62 }
 0x121   : > { %2454 = vmatpush3.bf16.msra.mxu1 %v2650_v61 }
 0x122   : > { %2455 = vmatprep.subr.bf16.mxu1 %v2652_v63 }
 0x123   : > { %2400 = vmatpush3.bf16.msra.mxu0 %v2651_v62 }
 0x124   : > { %2405 = vmatprep.subr.bf16.mxu0 %v2653_v0 }
 0x125   : > { %2456 = vmatpush3.bf16.msra.mxu1 %v2652_v63 }
 0x126   : > { %2402 = vmatmul.mubr.bf16.vlgmr.msra.gmra.mrb[8].mxu0 %v885_v37  ;;  %2457 = vmatprep.subr.bf16.mxu1 %v2654_v1  ;;  %v2688_v37 = vld [vmem:[%s3170_s6 + $0x208] sm:$0xff]  }
 0x127   : > { %2406 = vmatpush3.bf16.msra.mxu0 %v2653_v0  ;;  %2421 = vmatprep.mubr.bf16.mxu0 %v2943_v21  ;;  %v2673_v21 = vld [vmem:[%s3170_s6 + $0x190] sm:$0xff]  }
 0x128   : > { %2407 = vmatprep.subr.bf16.mxu0 %v2655_v2 }
 0x129   : > { %2458 = vmatpush3.bf16.msra.mxu1 %v2654_v1 }
 0x12a   : > { %2459 = vmatprep.subr.bf16.mxu1 %v2656_v3 }
 0x12b   : > { %2408 = vmatpush3.bf16.msra.mxu0 %v2655_v2 }
 0x12c   : > { %2409 = vmatprep.subr.bf16.mxu0 %v2657_v4 }
 0x12d   : > { %2460 = vmatpush3.bf16.msra.mxu1 %v2656_v3 }
 0x12e   : > { %2465 = vmatprep.subr.bf16.mxu1 %v2658_v5 }
 0x12f   : > { %2410 = vmatpush3.bf16.msra.mxu0 %v2657_v4 }
 0x130   : > { %2462 = vmatmul.mubr.bf16.vlgmr.msra.gmra.mrb[0].mxu1 %v1274_v50  ;;  %2411 = vmatprep.subr.bf16.mxu0 %v2659_v6 }
 0x131   : > { %2466 = vmatpush3.bf16.msra.mxu1 %v2658_v5  ;;  %2481 = vmatprep.mubr.bf16.mxu1 %v2950_v24  ;;  %v2676_v24 = vld [vmem:[%s3170_s6 + $0x1a8] sm:$0xff]  }
 0x132   : > { %2467 = vmatprep.subr.bf16.mxu1 %v2660_v7 }
 0x133   : > { %2412 = vmatpush3.bf16.msra.mxu0 %v2659_v6 }
 0x134   : > { %2413 = vmatprep.subr.bf16.mxu0 %v2661_v9 }
 0x135   : > { %2468 = vmatpush3.bf16.msra.mxu1 %v2660_v7 }
 0x136   : > { %2469 = vmatprep.subr.bf16.mxu1 %v2662_v10 }
 0x137   : > { %2414 = vmatpush3.bf16.msra.mxu0 %v2661_v9 }
 0x138   : > { %2415 = vmatprep.subr.bf16.mxu0 %v2663_v11 }
 0x139   : > { %2470 = vmatpush3.bf16.msra.mxu1 %v2662_v10 }
 0x13a   : > { %2471 = vmatprep.subr.bf16.mxu1 %v2664_v12 }
 0x13b   : > { %2416 = vmatpush3.bf16.msra.mxu0 %v2663_v11 }
 0x13c   : > { %2417 = vmatprep.subr.bf16.mxu0 %v2665_v13 }
 0x13d   : > { %2472 = vmatpush3.bf16.msra.mxu1 %v2664_v12 }
 0x13e   : > { %2473 = vmatprep.subr.bf16.mxu1 %v2666_v14 }
 0x13f   : > { %2418 = vmatpush3.bf16.msra.mxu0 %v2665_v13 }
 0x140   : > { %2419 = vmatprep.subr.bf16.mxu0 %v2667_v15 }
 0x141   : > { %2474 = vmatpush3.bf16.msra.mxu1 %v2666_v14 }
 0x142   : > { %2475 = vmatprep.subr.bf16.mxu1 %v2668_v16 }
 0x143   : > { %2420 = vmatpush3.bf16.msra.mxu0 %v2667_v15 }
 0x145   : > { %2476 = vmatpush3.bf16.msra.mxu1 %v2668_v16 }
 0x146   : > { %2422 = vmatmul.mubr.bf16.vlgmr.msra.gmra.mrb[8].mxu0 %v2960_v34  ;;  %2477 = vmatprep.subr.bf16.mxu1 %v2669_v17  ;;  %v2685_v34 = vld [vmem:[%s3170_s6 + $0x1f0] sm:$0xff]  }
 0x149   : > { %2478 = vmatpush3.bf16.msra.mxu1 %v2669_v17 }
 0x14a   : > { %2479 = vmatprep.subr.bf16.mxu1 %v2670_v18 }
 0x14d   : > { %2480 = vmatpush3.bf16.msra.mxu1 %v2670_v18 }
 0x14e   : > { %2485 = vmatprep.subr.bf16.mxu1 %v2671_v19 }
 0x150   : > { %2482 = vmatmul.mubr.bf16.vlgmr.msra.gmra.mrb[0].mxu1 %v2963_v35  ;;  %v2686_v35 = vld [vmem:[%s3170_s6 + $0x1f8] sm:$0xff]  }
 0x151   : > { %2486 = vmatpush3.bf16.msra.mxu1 %v2671_v19  ;;  %2501 = vmatprep.mubr.bf16.mxu1 %v2969_v38  ;;  %v2689_v38 = vld [vmem:[%s3170_s6 + $0x210] sm:$0xff]  }
 0x152   : > { %2487 = vmatprep.subr.bf16.mxu1 %v2672_v20 }
 0x155   : > { %2488 = vmatpush3.bf16.msra.mxu1 %v2672_v20 }
 0x156   : > { %2489 = vmatprep.subr.bf16.mxu1 %v2673_v21 }
 0x159   : > { %2490 = vmatpush3.bf16.msra.mxu1 %v2673_v21 }
 0x15a   : > { %2491 = vmatprep.subr.bf16.mxu1 %v2674_v22 }
 0x15d   : > { %2492 = vmatpush3.bf16.msra.mxu1 %v2674_v22 }
 0x15e   : > { %2493 = vmatprep.subr.bf16.mxu1 %v2675_v23 }
 0x161   : > { %2494 = vmatpush3.bf16.msra.mxu1 %v2675_v23 }
 0x162   : > { %2495 = vmatprep.subr.bf16.mxu1 %v2676_v24 }
 0x165   : > { %2496 = vmatpush3.bf16.msra.mxu1 %v2676_v24 }
 0x166   : > { %2497 = vmatprep.subr.bf16.mxu1 %v2677_v25 }
 0x169   : > { %2498 = vmatpush3.bf16.msra.mxu1 %v2677_v25 }
 0x16a   : > { %2499 = vmatprep.subr.bf16.mxu1 %v2678_v26 }
 0x16d   : > { %2500 = vmatpush3.bf16.msra.mxu1 %v2678_v26 }
 0x16e   : > { %2505 = vmatprep.subr.bf16.mxu1 %v2679_v27 }
 0x170   : > { %2502 = vmatmul.mubr.bf16.vlgmr.msra.gmra.mrb[0].mxu1 %v2972_v39  ;;  %v2690_v39 = vld [vmem:[%s3170_s6 + $0x218] sm:$0xff]  }
 0x171   : > { %2506 = vmatpush3.bf16.msra.mxu1 %v2679_v27  ;;  %2521 = vmatprep.mubr.bf16.mxu1 %v2994_v56 }
 0x172   : > { %2507 = vmatprep.subr.bf16.mxu1 %v2680_v28 }
 0x175   : > { %2508 = vmatpush3.bf16.msra.mxu1 %v2680_v28 }
 0x176   : > { %2509 = vmatprep.subr.bf16.mxu1 %v2681_v29 }
 0x179   : > { %2510 = vmatpush3.bf16.msra.mxu1 %v2681_v29 }
 0x17a   : > { %2511 = vmatprep.subr.bf16.mxu1 %v2682_v30 }
 0x17d   : > { %2512 = vmatpush3.bf16.msra.mxu1 %v2682_v30 }
 0x17e   : > { %2513 = vmatprep.subr.bf16.mxu1 %v2683_v31 }
 0x181   : > { %2514 = vmatpush3.bf16.msra.mxu1 %v2683_v31 }
 0x182   : > { %2515 = vmatprep.subr.bf16.mxu1 %v2684_v32 }
 0x185   : > { %2516 = vmatpush3.bf16.msra.mxu1 %v2684_v32 }
 0x186   : > { %2517 = vmatprep.subr.bf16.mxu1 %v2685_v34 }
 0x189   : > { %2518 = vmatpush3.bf16.msra.mxu1 %v2685_v34 }
 0x18a   : > { %2519 = vmatprep.subr.bf16.mxu1 %v2686_v35 }
 0x18d   : > { %2520 = vmatpush3.bf16.msra.mxu1 %v2686_v35 }
 0x18e   : > { %2525 = vmatprep.subr.bf16.mxu1 %v2687_v36 }
 0x190   : > { %2522 = vmatmul.mubr.bf16.vlgmr.msra.gmra.mrb[0].mxu1 %v3003_v60 }
 0x191   : > { %2526 = vmatpush3.bf16.msra.mxu1 %v2687_v36  ;;  %2541 = vmatprep.mubr.bf16.mxu1 %v2988_v55 }
 0x192   : > { %2527 = vmatprep.subr.bf16.mxu1 %v2688_v37 }
 0x195   : > { %2528 = vmatpush3.bf16.msra.mxu1 %v2688_v37 }
 0x196   : > { %2529 = vmatprep.subr.bf16.mxu1 %v2689_v38 }
 0x199   : > { %2530 = vmatpush3.bf16.msra.mxu1 %v2689_v38 }
 0x19a   : > { %2531 = vmatprep.subr.bf16.mxu1 %v2690_v39 }
 0x19d   : > { %2532 = vmatpush3.bf16.msra.mxu1 %v2690_v39 }
 0x19e   : > { %2533 = vmatprep.subr.bf16.mxu1 %v2691_v40 }
 0x1a1   : > { %2534 = vmatpush3.bf16.msra.mxu1 %v2691_v40 }
 0x1a2   : > { %2535 = vmatprep.subr.bf16.mxu1 %v2692_v41 }
 0x1a5   : > { %2536 = vmatpush3.bf16.msra.mxu1 %v2692_v41 }
 0x1a6   : > { %2537 = vmatprep.subr.bf16.mxu1 %v2693_v42 }
 0x1a9   : > { %2538 = vmatpush3.bf16.msra.mxu1 %v2693_v42 }
 0x1aa   : > { %2539 = vmatprep.subr.bf16.mxu1 %v2694_v43 }
 0x1ad   : > { %2540 = vmatpush3.bf16.msra.mxu1 %v2694_v43 }
 0x1b0   : > { %2542 = vmatmul.mubr.bf16.vlgmr.msra.gmra.mrb[0].mxu1 %v2997_v57 }
 0x219   : > { %v2423_v45 = vpop.f32.mrb[8].mxu0 }
 0x21a   : > { %v1099_v8 = vpop.f32.mrb[9].mxu0  ;;  %v2546_v50 = vadd.f32 %v2548_v44, %v2423_v45 }
 0x21b   : > { %v2424_v46 = vpop.f32.mrb[10].mxu0  ;;  %v2549_v51 = vadd.f32 %v2548_v44, %v1099_v8 }
 0x21c   : > { %v1102_v47 = vpop.f32.mrb[11].mxu0  ;;  %v2552_v53 = vadd.f32 %v2548_v44, %v2424_v46 }
 0x21d   : > { %v2555_v33 = vadd.f32 %v2548_v44, %v1102_v47 }
 0x283   : > { %v2543_v52 = vpop.f32.mrb[0].mxu1 }
 0x284   : > { %v2547_v54 = vadd.f32 %v2546_v50, %v2543_v52  ;;  %v1875_v55 = vpop.f32.mrb[1].mxu1 }
 0x285   : > { %v2550_v56 = vadd.f32 %v2549_v51, %v1875_v55  ;;  %v2544_v57 = vpop.f32.mrb[2].mxu1 }
 0x286   : > { %v1896_v58 = vmax.f32 %v2547_v54, 0.0  ;;  %v2553_v59 = vadd.f32 %v2552_v53, %v2544_v57  ;;  %v1878_v60 = vpop.f32.mrb[3].mxu1 }
 0x287   : > { %v1894_v61 = vmax.f32 %v2550_v56, 0.0  ;;  %v2556_v62 = vadd.f32 %v2555_v33, %v1878_v60 }
 0x288   : > { %1900 = vst [vmem:[%s329_s22 + $0x10] sm:$0xff] %v1896_v58  ;;  %v1897_v63 = vmax.f32 %v2553_v59, 0.0 }
 0x289   : > { %1898 = vst [vmem:[%s329_s22] sm:$0xff] %v1894_v61  ;;  %v1895_v0 = vmax.f32 %v2556_v62, 0.0 }
 0x28a   : > { %1901 = vst [vmem:[%s329_s22 + $0x18] sm:$0xff] %v1897_v63 }
 0x28b   : > { %1899 = vst [vmem:[%s329_s22 + $0x8] sm:$0xff] %v1895_v0 }
 0x28c PF: > { %s18_s27 = sadd.s32 1, %s2701_s27  }
 0x28d   : > { %p15_p5 = scmp.ge.s32.totalorder %s18_s27, 10  }
 0x28f   :  { %17 = sbr.rel (!%p15_p5) target bundleno = 1 (0x1), region = 93 }

</bundles_post_ra>
